<compile_context>
chip_gen: v7x
topology: tpu7x:2x2x1
jax: 0.10.0
libtpu: 0.0.40
codegen_flags: <defaults>
</compile_context>

<pallas_src>
import functools

import jax
import jax.numpy as jnp
from jax import lax
from jax.experimental import pallas as pl
from jax.experimental.pallas import tpu as pltpu


def _round_up(n, m):
    return ((n + m - 1) // m) * m


# ---------------------------------------------------------------------------
# Fused kernel
# ---------------------------------------------------------------------------
def _transformer_kernel(x_ref, w_in_ref, b_in_ref, pe_ref,
                        wqkv_ref, bqkv_ref, wo_ref, bo_ref,
                        w1_ref, b1_ref, w2_ref, b2_ref,
                        w_out_ref, b_out_ref,
                        probs_ref, logits_ref,
                        *, batch, seq, n_heads, n_tf_layers, out_dim):
    f32 = jnp.float32
    neg = f32(-1e30)
    n_rows = batch * seq                          # batch collapsed into rows
    model_dim = w_in_ref.shape[1]
    head_dim = model_dim // n_heads
    scale = f32(1.0 / (head_dim ** 0.5))

    # ---- input projection + learned positional embedding ------------------
    h = (jnp.dot(x_ref[...], w_in_ref[...], preferred_element_type=f32)
         + b_in_ref[...])                                        # (B*S, Dm)
    # positional table is (S, Dm); broadcast-add over the batch in-kernel
    h = (h.reshape(batch, seq, model_dim)
         + pe_ref[...][None, :, :]).reshape(n_rows, model_dim)

    # ---- causal additive bias, built & broadcast ONCE ----------------------
    row = lax.broadcasted_iota(jnp.int32, (seq, seq), 0)
    col = lax.broadcasted_iota(jnp.int32, (seq, seq), 1)
    causal_bias = jnp.broadcast_to(
        jnp.where(col <= row, f32(0.0), neg)[None, :, :],
        (batch, seq, seq))                                       # (B, S, S)

    # ---- transformer layers (static unroll; weights stacked on layer dim) -
    for l in range(n_tf_layers):
        # one fused QKV projection per layer: (B*S, Dm) @ (Dm, 3*Dm)
        qkv = (jnp.dot(h, wqkv_ref[l], preferred_element_type=f32)
               + bqkv_ref[l])                                    # (B*S, 3*Dm)
        heads = []
        for hh in range(n_heads):                 # heads via static lane slices
            o0 = hh * head_dim
            q3 = qkv[:, o0:o0 + head_dim].reshape(batch, seq, head_dim)
            k3 = qkv[:, model_dim + o0:
                        model_dim + o0 + head_dim].reshape(batch, seq, head_dim)
            v3 = qkv[:, 2 * model_dim + o0:
                        2 * model_dim + o0 + head_dim].reshape(batch, seq, head_dim)
            s = (jnp.einsum("bqd,bkd->bqk", q3, k3,
                            preferred_element_type=f32) * scale + causal_bias)
            s = s - jnp.max(s, axis=-1, keepdims=True)
            p = jnp.exp(s)
            p = p / jnp.sum(p, axis=-1, keepdims=True)           # exact divide
            o = jnp.einsum("bqk,bkd->bqd", p, v3, preferred_element_type=f32)
            heads.append(o.reshape(n_rows, head_dim))
        attn = jnp.concatenate(heads, axis=-1)                   # (B*S, Dm)
        # single w_o matmul; bias + attention residual folded straight in
        h1 = (jnp.dot(attn, wo_ref[l], preferred_element_type=f32)
              + bo_ref[l] + h)
        m = jnp.maximum(
            jnp.dot(h1, w1_ref[l], preferred_element_type=f32) + b1_ref[l], 0.0)
        h = (jnp.dot(m, w2_ref[l], preferred_element_type=f32)
             + b2_ref[l] + h1)                                   # MLP residual

    # ---- output projection + softmax over the real (unpadded) lanes -------
    logits = (jnp.dot(h, w_out_ref[...], preferred_element_type=f32)
              + b_out_ref[...])                                  # (B*S, Dp)
    logits_ref[...] = logits
    lane = lax.broadcasted_iota(jnp.int32, logits.shape, 1)
    z = jnp.where(lane < out_dim, logits, neg)                   # mask pad lanes
    z = z - jnp.max(z, axis=-1, keepdims=True)
    e = jnp.exp(z)
    probs_ref[...] = e / jnp.sum(e, axis=-1, keepdims=True)      # exact divide


# ---------------------------------------------------------------------------
# Wrapper
# ---------------------------------------------------------------------------
def _full_spec(shape):
    zeros = (0,) * len(shape)
    return pl.BlockSpec(shape, lambda i, _z=zeros: _z)


def transformer_forward(x, params, n_heads):
    B, S, in_dim = x.shape
    n_rows = B * S
    w_in = params["w_in_t"]                       # (Din, Dm) -- unpadded
    model_dim = w_in.shape[1]
    w_out = params["w_out_p"]                     # (Dm, Dout_p)
    dout_p = w_out.shape[1]
    out_dim = params["out_dim"]
    n_tf_layers = params["wqkv"].shape[0]
    pos_table = params["pos_table"]               # (max_length, Dm)
    assert S <= pos_table.shape[0], "sequence longer than max_length"

    x2 = x.reshape(n_rows, in_dim)                # no lane padding of x
    pe = pos_table[:S]                            # (S, Dm); broadcast in-kernel

    args = (x2, w_in, params["b_in"], pe,
            params["wqkv"], params["bqkv"], params["wo"], params["bo"],
            params["w1"], params["b1"], params["w2"], params["b2"],
            w_out, params["b_out_p"])

    kernel = functools.partial(
        _transformer_kernel, batch=B, seq=S, n_heads=n_heads,
        n_tf_layers=n_tf_layers, out_dim=out_dim)

    probs_p, logits_p = pl.pallas_call(
        kernel,
        out_shape=(jax.ShapeDtypeStruct((n_rows, dout_p), jnp.float32),
                   jax.ShapeDtypeStruct((n_rows, dout_p), jnp.float32)),
        grid=(1,),
        in_specs=[_full_spec(a.shape) for a in args],
        out_specs=[_full_spec((n_rows, dout_p)), _full_spec((n_rows, dout_p))],
        compiler_params=pltpu.CompilerParams(
            dimension_semantics=("arbitrary",)),
    )(*args)

    probs = probs_p[:, :out_dim].reshape(B, S, out_dim)
    logits = logits_p[:, :out_dim].reshape(B, S, out_dim)
    return probs, logits


# ---------------------------------------------------------------------------
# Parameter init (deterministic, PyTorch nn.Linear-style uniform) + layout prep
# ---------------------------------------------------------------------------
def _init_linear(key, fan_in, fan_out):
    kw, kb = jax.random.split(key)
    bound = 1.0 / (fan_in ** 0.5)
    w = jax.random.uniform(kw, (fan_out, fan_in), jnp.float32, -bound, bound)
    b = jax.random.uniform(kb, (fan_out,), jnp.float32, -bound, bound)
    return w, b


def init_transformer_params(key, in_dim, model_dim, n_heads, n_layers, max_length):
    assert model_dim % n_heads == 0
    assert n_layers >= 2
    dout_p = _round_up(in_dim, 128)

    keys = jax.random.split(key, 3 + (n_layers - 1))
    w_in, b_in = _init_linear(keys[0], in_dim, model_dim)        # (Dm, Din)
    w_pos, b_pos = _init_linear(keys[1], max_length, model_dim)  # (Dm, max_len)
    w_out, b_out = _init_linear(keys[2], model_dim, in_dim)      # (Din, Dm)

    w_in_t = w_in.T                                              # (Din, Dm)
    # LearnedPositionalEmbedding: one_hot(pos) @ W_pos.T + b == W_pos.T[pos] + b
    pos_table = w_pos.T + b_pos[None, :]                         # (max_len, Dm)
    # output head: transpose + zero-pad output features to 128 lanes
    w_out_p = jnp.zeros((model_dim, dout_p), jnp.float32).at[:, :in_dim].set(w_out.T)
    b_out_p = jnp.zeros((1, dout_p), jnp.float32).at[:, :in_dim].set(b_out[None, :])

    wqkv, bqkv, wo, bo, w1, b1, w2, b2 = ([] for _ in range(8))
    for li in range(n_layers - 1):
        lk = jax.random.split(keys[3 + li], 6)
        wq_, bq_ = _init_linear(lk[0], model_dim, model_dim)
        wk_, bk_ = _init_linear(lk[1], model_dim, model_dim)
        wv_, bv_ = _init_linear(lk[2], model_dim, model_dim)
        wo_, bo_ = _init_linear(lk[3], model_dim, model_dim)
        w1_, b1_ = _init_linear(lk[4], model_dim, model_dim)
        w2_, b2_ = _init_linear(lk[5], model_dim, model_dim)
        # fused QKV weight: columns [0:Dm]=Wq.T, [Dm:2Dm]=Wk.T, [2Dm:3Dm]=Wv.T
        wqkv.append(jnp.concatenate([wq_.T, wk_.T, wv_.T], axis=1))  # (Dm, 3Dm)
        bqkv.append(jnp.concatenate([bq_, bk_, bv_])[None, :])       # (1, 3Dm)
        wo.append(wo_.T)
        bo.append(bo_[None, :])
        w1.append(w1_.T)
        b1.append(b1_[None, :])
        w2.append(w2_.T)
        b2.append(b2_[None, :])

    stack = lambda xs: jnp.stack(xs, axis=0)     # layer axis in front
    return {
        "w_in_t": w_in_t, "b_in": b_in[None, :], "pos_table": pos_table,
        "w_out_p": w_out_p, "b_out_p": b_out_p, "out_dim": in_dim,
        "wqkv": stack(wqkv), "bqkv": stack(bqkv),
        "wo": stack(wo), "bo": stack(bo),
        "w1": stack(w1), "b1": stack(b1), "w2": stack(w2), "b2": stack(b2),
    }


# ---------------------------------------------------------------------------
# Pure-JAX reference (mirrors the PyTorch module) for a correctness check
# ---------------------------------------------------------------------------
def _reference_forward(x, params, n_heads):
    B, S, _ = x.shape
    dm = params["w_in_t"].shape[1]
    hd = dm // n_heads
    out_dim = params["out_dim"]
    h = x @ params["w_in_t"] + params["b_in"] + params["pos_table"][:S][None]
    row = jnp.arange(S)[:, None]
    col = jnp.arange(S)[None, :]
    bias = jnp.where(col <= row, 0.0, -1e30).astype(jnp.float32)
    for l in range(params["wqkv"].shape[0]):
        qkv = h @ params["wqkv"][l] + params["bqkv"][l]
        q, k, v = qkv[..., :dm], qkv[..., dm:2 * dm], qkv[..., 2 * dm:]
        split = lambda t: t.reshape(B, S, n_heads, hd).transpose(0, 2, 1, 3)
        qh, kh, vh = split(q), split(k), split(v)
        s = jnp.einsum("bhqd,bhkd->bhqk", qh, kh) / (hd ** 0.5) + bias
        p = jax.nn.softmax(s, axis=-1)
        o = jnp.einsum("bhqk,bhkd->bhqd", p, vh).transpose(0, 2, 1, 3).reshape(B, S, dm)
        h1 = o @ params["wo"][l] + params["bo"][l] + h
        m = jax.nn.relu(h1 @ params["w1"][l] + params["b1"][l])
        h = m @ params["w2"][l] + params["b2"][l] + h1
    logits = h @ params["w_out_p"][:, :out_dim] + params["b_out_p"][:, :out_dim]
    return jax.nn.softmax(logits, axis=-1), logits


# ---------------------------------------------------------------------------
if __name__ == "__main__":
    B, S = 2, 8
    in_dim, model_dim, n_heads, n_layers, max_length = 4, 32, 4, 3, 16

    key = jax.random.PRNGKey(0)
    k_x, k_p = jax.random.split(key)
    x = jax.random.normal(k_x, (B, S, in_dim), jnp.float32)
    params = init_transformer_params(k_p, in_dim, model_dim, n_heads,
                                     n_layers, max_length)

    probs, logits = transformer_forward(x, params, n_heads)
    jax.block_until_ready((probs, logits))

    assert probs.shape == (B, S, in_dim) and logits.shape == (B, S, in_dim)
    assert bool(jnp.all(jnp.isfinite(logits)))
    # exact divide in the kernel -> softmax rows sum to 1 to f32 rounding
    assert jnp.allclose(jnp.sum(probs, axis=-1), 1.0, atol=1e-3)

    # loose tolerance: matmul precision may differ slightly between Mosaic and XLA
    ref_probs, ref_logits = _reference_forward(x, params, n_heads)
    assert jnp.allclose(probs, ref_probs, atol=1e-2, rtol=1e-2)
    assert jnp.allclose(logits, ref_logits, atol=3e-2, rtol=3e-2)

    print("KERNEL_OK")
</pallas_src>

<mosaic_0001>
module attributes {stable_mosaic.version = 11 : i64} {
  func.func @_transformer_kernel(%arg0: i32, %arg1: memref<16x4xf32, #tpu.memory_space<vmem>>, %arg2: memref<4x32xf32, #tpu.memory_space<vmem>>, %arg3: memref<1x32xf32, #tpu.memory_space<vmem>>, %arg4: memref<8x32xf32, #tpu.memory_space<vmem>>, %arg5: memref<2x32x96xf32, #tpu.memory_space<vmem>>, %arg6: memref<2x1x96xf32, #tpu.memory_space<vmem>>, %arg7: memref<2x32x32xf32, #tpu.memory_space<vmem>>, %arg8: memref<2x1x32xf32, #tpu.memory_space<vmem>>, %arg9: memref<2x32x32xf32, #tpu.memory_space<vmem>>, %arg10: memref<2x1x32xf32, #tpu.memory_space<vmem>>, %arg11: memref<2x32x32xf32, #tpu.memory_space<vmem>>, %arg12: memref<2x1x32xf32, #tpu.memory_space<vmem>>, %arg13: memref<32x128xf32, #tpu.memory_space<vmem>>, %arg14: memref<1x128xf32, #tpu.memory_space<vmem>>, %arg15: memref<16x128xf32, #tpu.memory_space<vmem>>, %arg16: memref<16x128xf32, #tpu.memory_space<vmem>>) attributes {dimension_semantics = [#tpu.dimension_semantics<arbitrary>], iteration_bounds = array<i64: 1>, scalar_prefetch = 0 : i64, scratch_operands = 0 : i64, tpu.core_type = #tpu.core_type<tc>, window_params = [{pipeline_mode = #tpu.pipeline_mode<synchronous>, transform_indices = @transform_0, window_bounds = array<i64: 16, 4>}, {pipeline_mode = #tpu.pipeline_mode<synchronous>, transform_indices = @transform_1, window_bounds = array<i64: 4, 32>}, {pipeline_mode = #tpu.pipeline_mode<synchronous>, transform_indices = @transform_2, window_bounds = array<i64: 1, 32>}, {pipeline_mode = #tpu.pipeline_mode<synchronous>, transform_indices = @transform_3, window_bounds = array<i64: 8, 32>}, {pipeline_mode = #tpu.pipeline_mode<synchronous>, transform_indices = @transform_4, window_bounds = array<i64: 2, 32, 96>}, {pipeline_mode = #tpu.pipeline_mode<synchronous>, transform_indices = @transform_5, window_bounds = array<i64: 2, 1, 96>}, {pipeline_mode = #tpu.pipeline_mode<synchronous>, transform_indices = @transform_6, window_bounds = array<i64: 2, 32, 32>}, {pipeline_mode = #tpu.pipeline_mode<synchronous>, transform_indices = @transform_7, window_bounds = array<i64: 2, 1, 32>}, {pipeline_mode = #tpu.pipeline_mode<synchronous>, transform_indices = @transform_8, window_bounds = array<i64: 2, 32, 32>}, {pipeline_mode = #tpu.pipeline_mode<synchronous>, transform_indices = @transform_9, window_bounds = array<i64: 2, 1, 32>}, {pipeline_mode = #tpu.pipeline_mode<synchronous>, transform_indices = @transform_10, window_bounds = array<i64: 2, 32, 32>}, {pipeline_mode = #tpu.pipeline_mode<synchronous>, transform_indices = @transform_11, window_bounds = array<i64: 2, 1, 32>}, {pipeline_mode = #tpu.pipeline_mode<synchronous>, transform_indices = @transform_12, window_bounds = array<i64: 32, 128>}, {pipeline_mode = #tpu.pipeline_mode<synchronous>, transform_indices = @transform_13, window_bounds = array<i64: 1, 128>}, {pipeline_mode = #tpu.pipeline_mode<synchronous>, transform_indices = @transform_14, window_bounds = array<i64: 16, 128>}, {pipeline_mode = #tpu.pipeline_mode<synchronous>, transform_indices = @transform_15, window_bounds = array<i64: 16, 128>}]} {
    %c0 = arith.constant 0 : index
    %c0_0 = arith.constant 0 : index
    %0 = vector.load %arg1[%c0, %c0_0] : memref<16x4xf32, #tpu.memory_space<vmem>>, vector<16x4xf32>
    %c0_1 = arith.constant 0 : index
    %c0_2 = arith.constant 0 : index
    %1 = vector.load %arg2[%c0_1, %c0_2] : memref<4x32xf32, #tpu.memory_space<vmem>>, vector<4x32xf32>
    %cst = arith.constant dense<0.000000e+00> : vector<16x32xf32>
    %2 = tpu.matmul %0, %1, %cst {dimension_numbers = #tpu.dot_dimension_numbers<[1], [0], [0], [1], [0, 0, 1, 1], [], []>} : vector<16x4xf32>, vector<4x32xf32>, vector<16x32xf32> -> vector<16x32xf32>
    %c0_3 = arith.constant 0 : index
    %c0_4 = arith.constant 0 : index
    %3 = vector.load %arg3[%c0_3, %c0_4] : memref<1x32xf32, #tpu.memory_space<vmem>>, vector<1x32xf32>
    %4 = vector.broadcast %3 : vector<1x32xf32> to vector<16x32xf32>
    %5 = arith.addf %2, %4 : vector<16x32xf32>
    %6 = vector.shape_cast %5 : vector<16x32xf32> to vector<2x8x32xf32>
    %c0_5 = arith.constant 0 : index
    %c0_6 = arith.constant 0 : index
    %7 = vector.load %arg4[%c0_5, %c0_6] : memref<8x32xf32, #tpu.memory_space<vmem>>, vector<8x32xf32>
    %8 = vector.shape_cast %7 : vector<8x32xf32> to vector<1x8x32xf32>
    %9 = vector.broadcast %8 : vector<1x8x32xf32> to vector<2x8x32xf32>
    %10 = arith.addf %6, %9 : vector<2x8x32xf32>
    %11 = vector.shape_cast %10 : vector<2x8x32xf32> to vector<16x32xf32>
    %12 = tpu.iota {dimensions = array<i32: 0>} : vector<8x8xi32>
    %13 = tpu.iota {dimensions = array<i32: 1>} : vector<8x8xi32>
    %14 = arith.cmpi sle, %13, %12 : vector<8x8xi32>
    %cst_7 = arith.constant 0.000000e+00 : f32
    %cst_8 = arith.constant -1.000000e+30 : f32
    %15 = vector.broadcast %cst_7 : f32 to vector<8x8xf32>
    %16 = vector.broadcast %cst_8 : f32 to vector<8x8xf32>
    %17 = arith.select %14, %15, %16 : vector<8x8xi1>, vector<8x8xf32>
    %18 = vector.shape_cast %17 : vector<8x8xf32> to vector<1x8x8xf32>
    %19 = vector.shape_cast %18 : vector<1x8x8xf32> to vector<1x8x8xf32>
    %20 = vector.broadcast %19 : vector<1x8x8xf32> to vector<2x8x8xf32>
    %c0_9 = arith.constant 0 : index
    %c0_10 = arith.constant 0 : index
    %c0_11 = arith.constant 0 : index
    %21 = vector.load %arg5[%c0_9, %c0_10, %c0_11] : memref<2x32x96xf32, #tpu.memory_space<vmem>>, vector<1x32x96xf32>
    %22 = vector.shape_cast %21 : vector<1x32x96xf32> to vector<32x96xf32>
    %cst_12 = arith.constant dense<0.000000e+00> : vector<16x96xf32>
    %23 = tpu.matmul %11, %22, %cst_12 {dimension_numbers = #tpu.dot_dimension_numbers<[1], [0], [0], [1], [0, 0, 1, 1], [], []>} : vector<16x32xf32>, vector<32x96xf32>, vector<16x96xf32> -> vector<16x96xf32>
    %c0_13 = arith.constant 0 : index
    %c0_14 = arith.constant 0 : index
    %c0_15 = arith.constant 0 : index
    %24 = vector.load %arg6[%c0_13, %c0_14, %c0_15] : memref<2x1x96xf32, #tpu.memory_space<vmem>>, vector<1x1x96xf32>
    %25 = vector.shape_cast %24 : vector<1x1x96xf32> to vector<1x96xf32>
    %26 = vector.broadcast %25 : vector<1x96xf32> to vector<16x96xf32>
    %27 = arith.addf %23, %26 : vector<16x96xf32>
    %28 = vector.extract_strided_slice %27 {offsets = [0, 0], sizes = [16, 8], strides = [1, 1]} : vector<16x96xf32> to vector<16x8xf32>
    %29 = vector.shape_cast %28 : vector<16x8xf32> to vector<2x8x8xf32>
    %30 = vector.extract_strided_slice %27 {offsets = [0, 32], sizes = [16, 8], strides = [1, 1]} : vector<16x96xf32> to vector<16x8xf32>
    %31 = vector.shape_cast %30 : vector<16x8xf32> to vector<2x8x8xf32>
    %32 = vector.extract_strided_slice %27 {offsets = [0, 64], sizes = [16, 8], strides = [1, 1]} : vector<16x96xf32> to vector<16x8xf32>
    %33 = vector.shape_cast %32 : vector<16x8xf32> to vector<2x8x8xf32>
    "tpu.trace_start"() <{level = 10 : i32, message = "bqd,bkd->bqk"}> : () -> ()
    %cst_16 = arith.constant dense<0.000000e+00> : vector<2x8x8xf32>
    %34 = tpu.matmul %29, %31, %cst_16 {dimension_numbers = #tpu.dot_dimension_numbers<[2], [2], [1], [1], [0, 0, 0, 1, 1, 1], [0], [0]>} : vector<2x8x8xf32>, vector<2x8x8xf32>, vector<2x8x8xf32> -> vector<2x8x8xf32>
    "tpu.trace_stop"() : () -> ()
    %cst_17 = arith.constant 0.353553385 : f32
    %35 = vector.broadcast %cst_17 : f32 to vector<2x8x8xf32>
    %36 = arith.mulf %34, %35 : vector<2x8x8xf32>
    %37 = arith.addf %36, %20 : vector<2x8x8xf32>
    %cst_18 = arith.constant dense<0xFF800000> : vector<2x8xf32>
    %38 = vector.multi_reduction <maximumf>, %37, %cst_18 [2] : vector<2x8x8xf32> to vector<2x8xf32>
    %39 = vector.shape_cast %38 : vector<2x8xf32> to vector<2x8x1xf32>
    %40 = vector.broadcast %39 : vector<2x8x1xf32> to vector<2x8x8xf32>
    %41 = arith.subf %37, %40 : vector<2x8x8xf32>
    %42 = math.exp %41 : vector<2x8x8xf32>
    %cst_19 = arith.constant dense<0.000000e+00> : vector<2x8xf32>
    %43 = vector.multi_reduction <add>, %42, %cst_19 [2] : vector<2x8x8xf32> to vector<2x8xf32>
    %44 = vector.shape_cast %43 : vector<2x8xf32> to vector<2x8x1xf32>
    %45 = vector.broadcast %44 : vector<2x8x1xf32> to vector<2x8x8xf32>
    %46 = arith.divf %42, %45 : vector<2x8x8xf32>
    "tpu.trace_start"() <{level = 10 : i32, message = "bqk,bkd->bqd"}> : () -> ()
    %cst_20 = arith.constant dense<0.000000e+00> : vector<2x8x8xf32>
    %47 = tpu.matmul %46, %33, %cst_20 {dimension_numbers = #tpu.dot_dimension_numbers<[2], [1], [1], [2], [0, 0, 0, 1, 1, 2], [0], [0]>} : vector<2x8x8xf32>, vector<2x8x8xf32>, vector<2x8x8xf32> -> vector<2x8x8xf32>
    "tpu.trace_stop"() : () -> ()
    %48 = vector.shape_cast %47 : vector<2x8x8xf32> to vector<16x8xf32>
    %49 = vector.extract_strided_slice %27 {offsets = [0, 8], sizes = [16, 8], strides = [1, 1]} : vector<16x96xf32> to vector<16x8xf32>
    %50 = vector.shape_cast %49 : vector<16x8xf32> to vector<2x8x8xf32>
    %51 = vector.extract_strided_slice %27 {offsets = [0, 40], sizes = [16, 8], strides = [1, 1]} : vector<16x96xf32> to vector<16x8xf32>
    %52 = vector.shape_cast %51 : vector<16x8xf32> to vector<2x8x8xf32>
    %53 = vector.extract_strided_slice %27 {offsets = [0, 72], sizes = [16, 8], strides = [1, 1]} : vector<16x96xf32> to vector<16x8xf32>
    %54 = vector.shape_cast %53 : vector<16x8xf32> to vector<2x8x8xf32>
    "tpu.trace_start"() <{level = 10 : i32, message = "bqd,bkd->bqk"}> : () -> ()
    %cst_21 = arith.constant dense<0.000000e+00> : vector<2x8x8xf32>
    %55 = tpu.matmul %50, %52, %cst_21 {dimension_numbers = #tpu.dot_dimension_numbers<[2], [2], [1], [1], [0, 0, 0, 1, 1, 1], [0], [0]>} : vector<2x8x8xf32>, vector<2x8x8xf32>, vector<2x8x8xf32> -> vector<2x8x8xf32>
    "tpu.trace_stop"() : () -> ()
    %cst_22 = arith.constant 0.353553385 : f32
    %56 = vector.broadcast %cst_22 : f32 to vector<2x8x8xf32>
    %57 = arith.mulf %55, %56 : vector<2x8x8xf32>
    %58 = arith.addf %57, %20 : vector<2x8x8xf32>
    %cst_23 = arith.constant dense<0xFF800000> : vector<2x8xf32>
    %59 = vector.multi_reduction <maximumf>, %58, %cst_23 [2] : vector<2x8x8xf32> to vector<2x8xf32>
    %60 = vector.shape_cast %59 : vector<2x8xf32> to vector<2x8x1xf32>
    %61 = vector.broadcast %60 : vector<2x8x1xf32> to vector<2x8x8xf32>
    %62 = arith.subf %58, %61 : vector<2x8x8xf32>
    %63 = math.exp %62 : vector<2x8x8xf32>
    %cst_24 = arith.constant dense<0.000000e+00> : vector<2x8xf32>
    %64 = vector.multi_reduction <add>, %63, %cst_24 [2] : vector<2x8x8xf32> to vector<2x8xf32>
    %65 = vector.shape_cast %64 : vector<2x8xf32> to vector<2x8x1xf32>
    %66 = vector.broadcast %65 : vector<2x8x1xf32> to vector<2x8x8xf32>
    %67 = arith.divf %63, %66 : vector<2x8x8xf32>
    "tpu.trace_start"() <{level = 10 : i32, message = "bqk,bkd->bqd"}> : () -> ()
    %cst_25 = arith.constant dense<0.000000e+00> : vector<2x8x8xf32>
    %68 = tpu.matmul %67, %54, %cst_25 {dimension_numbers = #tpu.dot_dimension_numbers<[2], [1], [1], [2], [0, 0, 0, 1, 1, 2], [0], [0]>} : vector<2x8x8xf32>, vector<2x8x8xf32>, vector<2x8x8xf32> -> vector<2x8x8xf32>
    "tpu.trace_stop"() : () -> ()
    %69 = vector.shape_cast %68 : vector<2x8x8xf32> to vector<16x8xf32>
    %70 = vector.extract_strided_slice %27 {offsets = [0, 16], sizes = [16, 8], strides = [1, 1]} : vector<16x96xf32> to vector<16x8xf32>
    %71 = vector.shape_cast %70 : vector<16x8xf32> to vector<2x8x8xf32>
    %72 = vector.extract_strided_slice %27 {offsets = [0, 48], sizes = [16, 8], strides = [1, 1]} : vector<16x96xf32> to vector<16x8xf32>
    %73 = vector.shape_cast %72 : vector<16x8xf32> to vector<2x8x8xf32>
    %74 = vector.extract_strided_slice %27 {offsets = [0, 80], sizes = [16, 8], strides = [1, 1]} : vector<16x96xf32> to vector<16x8xf32>
    %75 = vector.shape_cast %74 : vector<16x8xf32> to vector<2x8x8xf32>
    "tpu.trace_start"() <{level = 10 : i32, message = "bqd,bkd->bqk"}> : () -> ()
    %cst_26 = arith.constant dense<0.000000e+00> : vector<2x8x8xf32>
    %76 = tpu.matmul %71, %73, %cst_26 {dimension_numbers = #tpu.dot_dimension_numbers<[2], [2], [1], [1], [0, 0, 0, 1, 1, 1], [0], [0]>} : vector<2x8x8xf32>, vector<2x8x8xf32>, vector<2x8x8xf32> -> vector<2x8x8xf32>
    "tpu.trace_stop"() : () -> ()
    %cst_27 = arith.constant 0.353553385 : f32
    %77 = vector.broadcast %cst_27 : f32 to vector<2x8x8xf32>
    %78 = arith.mulf %76, %77 : vector<2x8x8xf32>
    %79 = arith.addf %78, %20 : vector<2x8x8xf32>
    %cst_28 = arith.constant dense<0xFF800000> : vector<2x8xf32>
    %80 = vector.multi_reduction <maximumf>, %79, %cst_28 [2] : vector<2x8x8xf32> to vector<2x8xf32>
    %81 = vector.shape_cast %80 : vector<2x8xf32> to vector<2x8x1xf32>
    %82 = vector.broadcast %81 : vector<2x8x1xf32> to vector<2x8x8xf32>
    %83 = arith.subf %79, %82 : vector<2x8x8xf32>
    %84 = math.exp %83 : vector<2x8x8xf32>
    %cst_29 = arith.constant dense<0.000000e+00> : vector<2x8xf32>
    %85 = vector.multi_reduction <add>, %84, %cst_29 [2] : vector<2x8x8xf32> to vector<2x8xf32>
    %86 = vector.shape_cast %85 : vector<2x8xf32> to vector<2x8x1xf32>
    %87 = vector.broadcast %86 : vector<2x8x1xf32> to vector<2x8x8xf32>
    %88 = arith.divf %84, %87 : vector<2x8x8xf32>
    "tpu.trace_start"() <{level = 10 : i32, message = "bqk,bkd->bqd"}> : () -> ()
    %cst_30 = arith.constant dense<0.000000e+00> : vector<2x8x8xf32>
    %89 = tpu.matmul %88, %75, %cst_30 {dimension_numbers = #tpu.dot_dimension_numbers<[2], [1], [1], [2], [0, 0, 0, 1, 1, 2], [0], [0]>} : vector<2x8x8xf32>, vector<2x8x8xf32>, vector<2x8x8xf32> -> vector<2x8x8xf32>
    "tpu.trace_stop"() : () -> ()
    %90 = vector.shape_cast %89 : vector<2x8x8xf32> to vector<16x8xf32>
    %91 = vector.extract_strided_slice %27 {offsets = [0, 24], sizes = [16, 8], strides = [1, 1]} : vector<16x96xf32> to vector<16x8xf32>
    %92 = vector.shape_cast %91 : vector<16x8xf32> to vector<2x8x8xf32>
    %93 = vector.extract_strided_slice %27 {offsets = [0, 56], sizes = [16, 8], strides = [1, 1]} : vector<16x96xf32> to vector<16x8xf32>
    %94 = vector.shape_cast %93 : vector<16x8xf32> to vector<2x8x8xf32>
    %95 = vector.extract_strided_slice %27 {offsets = [0, 88], sizes = [16, 8], strides = [1, 1]} : vector<16x96xf32> to vector<16x8xf32>
    %96 = vector.shape_cast %95 : vector<16x8xf32> to vector<2x8x8xf32>
    "tpu.trace_start"() <{level = 10 : i32, message = "bqd,bkd->bqk"}> : () -> ()
    %cst_31 = arith.constant dense<0.000000e+00> : vector<2x8x8xf32>
    %97 = tpu.matmul %92, %94, %cst_31 {dimension_numbers = #tpu.dot_dimension_numbers<[2], [2], [1], [1], [0, 0, 0, 1, 1, 1], [0], [0]>} : vector<2x8x8xf32>, vector<2x8x8xf32>, vector<2x8x8xf32> -> vector<2x8x8xf32>
    "tpu.trace_stop"() : () -> ()
    %cst_32 = arith.constant 0.353553385 : f32
    %98 = vector.broadcast %cst_32 : f32 to vector<2x8x8xf32>
    %99 = arith.mulf %97, %98 : vector<2x8x8xf32>
    %100 = arith.addf %99, %20 : vector<2x8x8xf32>
    %cst_33 = arith.constant dense<0xFF800000> : vector<2x8xf32>
    %101 = vector.multi_reduction <maximumf>, %100, %cst_33 [2] : vector<2x8x8xf32> to vector<2x8xf32>
    %102 = vector.shape_cast %101 : vector<2x8xf32> to vector<2x8x1xf32>
    %103 = vector.broadcast %102 : vector<2x8x1xf32> to vector<2x8x8xf32>
    %104 = arith.subf %100, %103 : vector<2x8x8xf32>
    %105 = math.exp %104 : vector<2x8x8xf32>
    %cst_34 = arith.constant dense<0.000000e+00> : vector<2x8xf32>
    %106 = vector.multi_reduction <add>, %105, %cst_34 [2] : vector<2x8x8xf32> to vector<2x8xf32>
    %107 = vector.shape_cast %106 : vector<2x8xf32> to vector<2x8x1xf32>
    %108 = vector.broadcast %107 : vector<2x8x1xf32> to vector<2x8x8xf32>
    %109 = arith.divf %105, %108 : vector<2x8x8xf32>
    "tpu.trace_start"() <{level = 10 : i32, message = "bqk,bkd->bqd"}> : () -> ()
    %cst_35 = arith.constant dense<0.000000e+00> : vector<2x8x8xf32>
    %110 = tpu.matmul %109, %96, %cst_35 {dimension_numbers = #tpu.dot_dimension_numbers<[2], [1], [1], [2], [0, 0, 0, 1, 1, 2], [0], [0]>} : vector<2x8x8xf32>, vector<2x8x8xf32>, vector<2x8x8xf32> -> vector<2x8x8xf32>
    "tpu.trace_stop"() : () -> ()
    %111 = vector.shape_cast %110 : vector<2x8x8xf32> to vector<16x8xf32>
    %112 = tpu.concatenate %48, %69, %90, %111 in 1 : vector<16x8xf32>, vector<16x8xf32>, vector<16x8xf32>, vector<16x8xf32> -> vector<16x32xf32>
    %c0_36 = arith.constant 0 : index
    %c0_37 = arith.constant 0 : index
    %c0_38 = arith.constant 0 : index
    %113 = vector.load %arg7[%c0_36, %c0_37, %c0_38] : memref<2x32x32xf32, #tpu.memory_space<vmem>>, vector<1x32x32xf32>
    %114 = vector.shape_cast %113 : vector<1x32x32xf32> to vector<32x32xf32>
    %cst_39 = arith.constant dense<0.000000e+00> : vector<16x32xf32>
    %115 = tpu.matmul %112, %114, %cst_39 {dimension_numbers = #tpu.dot_dimension_numbers<[1], [0], [0], [1], [0, 0, 1, 1], [], []>} : vector<16x32xf32>, vector<32x32xf32>, vector<16x32xf32> -> vector<16x32xf32>
    %c0_40 = arith.constant 0 : index
    %c0_41 = arith.constant 0 : index
    %c0_42 = arith.constant 0 : index
    %116 = vector.load %arg8[%c0_40, %c0_41, %c0_42] : memref<2x1x32xf32, #tpu.memory_space<vmem>>, vector<1x1x32xf32>
    %117 = vector.shape_cast %116 : vector<1x1x32xf32> to vector<1x32xf32>
    %118 = vector.broadcast %117 : vector<1x32xf32> to vector<16x32xf32>
    %119 = arith.addf %115, %118 : vector<16x32xf32>
    %120 = arith.addf %119, %11 : vector<16x32xf32>
    %c0_43 = arith.constant 0 : index
    %c0_44 = arith.constant 0 : index
    %c0_45 = arith.constant 0 : index
    %121 = vector.load %arg9[%c0_43, %c0_44, %c0_45] : memref<2x32x32xf32, #tpu.memory_space<vmem>>, vector<1x32x32xf32>
    %122 = vector.shape_cast %121 : vector<1x32x32xf32> to vector<32x32xf32>
    %cst_46 = arith.constant dense<0.000000e+00> : vector<16x32xf32>
    %123 = tpu.matmul %120, %122, %cst_46 {dimension_numbers = #tpu.dot_dimension_numbers<[1], [0], [0], [1], [0, 0, 1, 1], [], []>} : vector<16x32xf32>, vector<32x32xf32>, vector<16x32xf32> -> vector<16x32xf32>
    %c0_47 = arith.constant 0 : index
    %c0_48 = arith.constant 0 : index
    %c0_49 = arith.constant 0 : index
    %124 = vector.load %arg10[%c0_47, %c0_48, %c0_49] : memref<2x1x32xf32, #tpu.memory_space<vmem>>, vector<1x1x32xf32>
    %125 = vector.shape_cast %124 : vector<1x1x32xf32> to vector<1x32xf32>
    %126 = vector.broadcast %125 : vector<1x32xf32> to vector<16x32xf32>
    %127 = arith.addf %123, %126 : vector<16x32xf32>
    %cst_50 = arith.constant 0.000000e+00 : f32
    %128 = vector.broadcast %cst_50 : f32 to vector<16x32xf32>
    %129 = arith.maximumf %127, %128 : vector<16x32xf32>
    %c0_51 = arith.constant 0 : index
    %c0_52 = arith.constant 0 : index
    %c0_53 = arith.constant 0 : index
    %130 = vector.load %arg11[%c0_51, %c0_52, %c0_53] : memref<2x32x32xf32, #tpu.memory_space<vmem>>, vector<1x32x32xf32>
    %131 = vector.shape_cast %130 : vector<1x32x32xf32> to vector<32x32xf32>
    %cst_54 = arith.constant dense<0.000000e+00> : vector<16x32xf32>
    %132 = tpu.matmul %129, %131, %cst_54 {dimension_numbers = #tpu.dot_dimension_numbers<[1], [0], [0], [1], [0, 0, 1, 1], [], []>} : vector<16x32xf32>, vector<32x32xf32>, vector<16x32xf32> -> vector<16x32xf32>
    %c0_55 = arith.constant 0 : index
    %c0_56 = arith.constant 0 : index
    %c0_57 = arith.constant 0 : index
    %133 = vector.load %arg12[%c0_55, %c0_56, %c0_57] : memref<2x1x32xf32, #tpu.memory_space<vmem>>, vector<1x1x32xf32>
    %134 = vector.shape_cast %133 : vector<1x1x32xf32> to vector<1x32xf32>
    %135 = vector.broadcast %134 : vector<1x32xf32> to vector<16x32xf32>
    %136 = arith.addf %132, %135 : vector<16x32xf32>
    %137 = arith.addf %136, %120 : vector<16x32xf32>
    %c1 = arith.constant 1 : index
    %c0_58 = arith.constant 0 : index
    %c0_59 = arith.constant 0 : index
    %138 = vector.load %arg5[%c1, %c0_58, %c0_59] : memref<2x32x96xf32, #tpu.memory_space<vmem>>, vector<1x32x96xf32>
    %139 = vector.shape_cast %138 : vector<1x32x96xf32> to vector<32x96xf32>
    %cst_60 = arith.constant dense<0.000000e+00> : vector<16x96xf32>
    %140 = tpu.matmul %137, %139, %cst_60 {dimension_numbers = #tpu.dot_dimension_numbers<[1], [0], [0], [1], [0, 0, 1, 1], [], []>} : vector<16x32xf32>, vector<32x96xf32>, vector<16x96xf32> -> vector<16x96xf32>
    %c1_61 = arith.constant 1 : index
    %c0_62 = arith.constant 0 : index
    %c0_63 = arith.constant 0 : index
    %141 = vector.load %arg6[%c1_61, %c0_62, %c0_63] : memref<2x1x96xf32, #tpu.memory_space<vmem>>, vector<1x1x96xf32>
    %142 = vector.shape_cast %141 : vector<1x1x96xf32> to vector<1x96xf32>
    %143 = vector.broadcast %142 : vector<1x96xf32> to vector<16x96xf32>
    %144 = arith.addf %140, %143 : vector<16x96xf32>
    %145 = vector.extract_strided_slice %144 {offsets = [0, 0], sizes = [16, 8], strides = [1, 1]} : vector<16x96xf32> to vector<16x8xf32>
    %146 = vector.shape_cast %145 : vector<16x8xf32> to vector<2x8x8xf32>
    %147 = vector.extract_strided_slice %144 {offsets = [0, 32], sizes = [16, 8], strides = [1, 1]} : vector<16x96xf32> to vector<16x8xf32>
    %148 = vector.shape_cast %147 : vector<16x8xf32> to vector<2x8x8xf32>
    %149 = vector.extract_strided_slice %144 {offsets = [0, 64], sizes = [16, 8], strides = [1, 1]} : vector<16x96xf32> to vector<16x8xf32>
    %150 = vector.shape_cast %149 : vector<16x8xf32> to vector<2x8x8xf32>
    "tpu.trace_start"() <{level = 10 : i32, message = "bqd,bkd->bqk"}> : () -> ()
    %cst_64 = arith.constant dense<0.000000e+00> : vector<2x8x8xf32>
    %151 = tpu.matmul %146, %148, %cst_64 {dimension_numbers = #tpu.dot_dimension_numbers<[2], [2], [1], [1], [0, 0, 0, 1, 1, 1], [0], [0]>} : vector<2x8x8xf32>, vector<2x8x8xf32>, vector<2x8x8xf32> -> vector<2x8x8xf32>
    "tpu.trace_stop"() : () -> ()
    %cst_65 = arith.constant 0.353553385 : f32
    %152 = vector.broadcast %cst_65 : f32 to vector<2x8x8xf32>
    %153 = arith.mulf %151, %152 : vector<2x8x8xf32>
    %154 = arith.addf %153, %20 : vector<2x8x8xf32>
    %cst_66 = arith.constant dense<0xFF800000> : vector<2x8xf32>
    %155 = vector.multi_reduction <maximumf>, %154, %cst_66 [2] : vector<2x8x8xf32> to vector<2x8xf32>
    %156 = vector.shape_cast %155 : vector<2x8xf32> to vector<2x8x1xf32>
    %157 = vector.broadcast %156 : vector<2x8x1xf32> to vector<2x8x8xf32>
    %158 = arith.subf %154, %157 : vector<2x8x8xf32>
    %159 = math.exp %158 : vector<2x8x8xf32>
    %cst_67 = arith.constant dense<0.000000e+00> : vector<2x8xf32>
    %160 = vector.multi_reduction <add>, %159, %cst_67 [2] : vector<2x8x8xf32> to vector<2x8xf32>
    %161 = vector.shape_cast %160 : vector<2x8xf32> to vector<2x8x1xf32>
    %162 = vector.broadcast %161 : vector<2x8x1xf32> to vector<2x8x8xf32>
    %163 = arith.divf %159, %162 : vector<2x8x8xf32>
    "tpu.trace_start"() <{level = 10 : i32, message = "bqk,bkd->bqd"}> : () -> ()
    %cst_68 = arith.constant dense<0.000000e+00> : vector<2x8x8xf32>
    %164 = tpu.matmul %163, %150, %cst_68 {dimension_numbers = #tpu.dot_dimension_numbers<[2], [1], [1], [2], [0, 0, 0, 1, 1, 2], [0], [0]>} : vector<2x8x8xf32>, vector<2x8x8xf32>, vector<2x8x8xf32> -> vector<2x8x8xf32>
    "tpu.trace_stop"() : () -> ()
    %165 = vector.shape_cast %164 : vector<2x8x8xf32> to vector<16x8xf32>
    %166 = vector.extract_strided_slice %144 {offsets = [0, 8], sizes = [16, 8], strides = [1, 1]} : vector<16x96xf32> to vector<16x8xf32>
    %167 = vector.shape_cast %166 : vector<16x8xf32> to vector<2x8x8xf32>
    %168 = vector.extract_strided_slice %144 {offsets = [0, 40], sizes = [16, 8], strides = [1, 1]} : vector<16x96xf32> to vector<16x8xf32>
    %169 = vector.shape_cast %168 : vector<16x8xf32> to vector<2x8x8xf32>
    %170 = vector.extract_strided_slice %144 {offsets = [0, 72], sizes = [16, 8], strides = [1, 1]} : vector<16x96xf32> to vector<16x8xf32>
    %171 = vector.shape_cast %170 : vector<16x8xf32> to vector<2x8x8xf32>
    "tpu.trace_start"() <{level = 10 : i32, message = "bqd,bkd->bqk"}> : () -> ()
    %cst_69 = arith.constant dense<0.000000e+00> : vector<2x8x8xf32>
    %172 = tpu.matmul %167, %169, %cst_69 {dimension_numbers = #tpu.dot_dimension_numbers<[2], [2], [1], [1], [0, 0, 0, 1, 1, 1], [0], [0]>} : vector<2x8x8xf32>, vector<2x8x8xf32>, vector<2x8x8xf32> -> vector<2x8x8xf32>
    "tpu.trace_stop"() : () -> ()
    %cst_70 = arith.constant 0.353553385 : f32
    %173 = vector.broadcast %cst_70 : f32 to vector<2x8x8xf32>
    %174 = arith.mulf %172, %173 : vector<2x8x8xf32>
    %175 = arith.addf %174, %20 : vector<2x8x8xf32>
    %cst_71 = arith.constant dense<0xFF800000> : vector<2x8xf32>
    %176 = vector.multi_reduction <maximumf>, %175, %cst_71 [2] : vector<2x8x8xf32> to vector<2x8xf32>
    %177 = vector.shape_cast %176 : vector<2x8xf32> to vector<2x8x1xf32>
    %178 = vector.broadcast %177 : vector<2x8x1xf32> to vector<2x8x8xf32>
    %179 = arith.subf %175, %178 : vector<2x8x8xf32>
    %180 = math.exp %179 : vector<2x8x8xf32>
    %cst_72 = arith.constant dense<0.000000e+00> : vector<2x8xf32>
    %181 = vector.multi_reduction <add>, %180, %cst_72 [2] : vector<2x8x8xf32> to vector<2x8xf32>
    %182 = vector.shape_cast %181 : vector<2x8xf32> to vector<2x8x1xf32>
    %183 = vector.broadcast %182 : vector<2x8x1xf32> to vector<2x8x8xf32>
    %184 = arith.divf %180, %183 : vector<2x8x8xf32>
    "tpu.trace_start"() <{level = 10 : i32, message = "bqk,bkd->bqd"}> : () -> ()
    %cst_73 = arith.constant dense<0.000000e+00> : vector<2x8x8xf32>
    %185 = tpu.matmul %184, %171, %cst_73 {dimension_numbers = #tpu.dot_dimension_numbers<[2], [1], [1], [2], [0, 0, 0, 1, 1, 2], [0], [0]>} : vector<2x8x8xf32>, vector<2x8x8xf32>, vector<2x8x8xf32> -> vector<2x8x8xf32>
    "tpu.trace_stop"() : () -> ()
    %186 = vector.shape_cast %185 : vector<2x8x8xf32> to vector<16x8xf32>
    %187 = vector.extract_strided_slice %144 {offsets = [0, 16], sizes = [16, 8], strides = [1, 1]} : vector<16x96xf32> to vector<16x8xf32>
    %188 = vector.shape_cast %187 : vector<16x8xf32> to vector<2x8x8xf32>
    %189 = vector.extract_strided_slice %144 {offsets = [0, 48], sizes = [16, 8], strides = [1, 1]} : vector<16x96xf32> to vector<16x8xf32>
    %190 = vector.shape_cast %189 : vector<16x8xf32> to vector<2x8x8xf32>
    %191 = vector.extract_strided_slice %144 {offsets = [0, 80], sizes = [16, 8], strides = [1, 1]} : vector<16x96xf32> to vector<16x8xf32>
    %192 = vector.shape_cast %191 : vector<16x8xf32> to vector<2x8x8xf32>
    "tpu.trace_start"() <{level = 10 : i32, message = "bqd,bkd->bqk"}> : () -> ()
    %cst_74 = arith.constant dense<0.000000e+00> : vector<2x8x8xf32>
    %193 = tpu.matmul %188, %190, %cst_74 {dimension_numbers = #tpu.dot_dimension_numbers<[2], [2], [1], [1], [0, 0, 0, 1, 1, 1], [0], [0]>} : vector<2x8x8xf32>, vector<2x8x8xf32>, vector<2x8x8xf32> -> vector<2x8x8xf32>
    "tpu.trace_stop"() : () -> ()
    %cst_75 = arith.constant 0.353553385 : f32
    %194 = vector.broadcast %cst_75 : f32 to vector<2x8x8xf32>
    %195 = arith.mulf %193, %194 : vector<2x8x8xf32>
    %196 = arith.addf %195, %20 : vector<2x8x8xf32>
    %cst_76 = arith.constant dense<0xFF800000> : vector<2x8xf32>
    %197 = vector.multi_reduction <maximumf>, %196, %cst_76 [2] : vector<2x8x8xf32> to vector<2x8xf32>
    %198 = vector.shape_cast %197 : vector<2x8xf32> to vector<2x8x1xf32>
    %199 = vector.broadcast %198 : vector<2x8x1xf32> to vector<2x8x8xf32>
    %200 = arith.subf %196, %199 : vector<2x8x8xf32>
    %201 = math.exp %200 : vector<2x8x8xf32>
    %cst_77 = arith.constant dense<0.000000e+00> : vector<2x8xf32>
    %202 = vector.multi_reduction <add>, %201, %cst_77 [2] : vector<2x8x8xf32> to vector<2x8xf32>
    %203 = vector.shape_cast %202 : vector<2x8xf32> to vector<2x8x1xf32>
    %204 = vector.broadcast %203 : vector<2x8x1xf32> to vector<2x8x8xf32>
    %205 = arith.divf %201, %204 : vector<2x8x8xf32>
    "tpu.trace_start"() <{level = 10 : i32, message = "bqk,bkd->bqd"}> : () -> ()
    %cst_78 = arith.constant dense<0.000000e+00> : vector<2x8x8xf32>
    %206 = tpu.matmul %205, %192, %cst_78 {dimension_numbers = #tpu.dot_dimension_numbers<[2], [1], [1], [2], [0, 0, 0, 1, 1, 2], [0], [0]>} : vector<2x8x8xf32>, vector<2x8x8xf32>, vector<2x8x8xf32> -> vector<2x8x8xf32>
    "tpu.trace_stop"() : () -> ()
    %207 = vector.shape_cast %206 : vector<2x8x8xf32> to vector<16x8xf32>
    %208 = vector.extract_strided_slice %144 {offsets = [0, 24], sizes = [16, 8], strides = [1, 1]} : vector<16x96xf32> to vector<16x8xf32>
    %209 = vector.shape_cast %208 : vector<16x8xf32> to vector<2x8x8xf32>
    %210 = vector.extract_strided_slice %144 {offsets = [0, 56], sizes = [16, 8], strides = [1, 1]} : vector<16x96xf32> to vector<16x8xf32>
    %211 = vector.shape_cast %210 : vector<16x8xf32> to vector<2x8x8xf32>
    %212 = vector.extract_strided_slice %144 {offsets = [0, 88], sizes = [16, 8], strides = [1, 1]} : vector<16x96xf32> to vector<16x8xf32>
    %213 = vector.shape_cast %212 : vector<16x8xf32> to vector<2x8x8xf32>
    "tpu.trace_start"() <{level = 10 : i32, message = "bqd,bkd->bqk"}> : () -> ()
    %cst_79 = arith.constant dense<0.000000e+00> : vector<2x8x8xf32>
    %214 = tpu.matmul %209, %211, %cst_79 {dimension_numbers = #tpu.dot_dimension_numbers<[2], [2], [1], [1], [0, 0, 0, 1, 1, 1], [0], [0]>} : vector<2x8x8xf32>, vector<2x8x8xf32>, vector<2x8x8xf32> -> vector<2x8x8xf32>
    "tpu.trace_stop"() : () -> ()
    %cst_80 = arith.constant 0.353553385 : f32
    %215 = vector.broadcast %cst_80 : f32 to vector<2x8x8xf32>
    %216 = arith.mulf %214, %215 : vector<2x8x8xf32>
    %217 = arith.addf %216, %20 : vector<2x8x8xf32>
    %cst_81 = arith.constant dense<0xFF800000> : vector<2x8xf32>
    %218 = vector.multi_reduction <maximumf>, %217, %cst_81 [2] : vector<2x8x8xf32> to vector<2x8xf32>
    %219 = vector.shape_cast %218 : vector<2x8xf32> to vector<2x8x1xf32>
    %220 = vector.broadcast %219 : vector<2x8x1xf32> to vector<2x8x8xf32>
    %221 = arith.subf %217, %220 : vector<2x8x8xf32>
    %222 = math.exp %221 : vector<2x8x8xf32>
    %cst_82 = arith.constant dense<0.000000e+00> : vector<2x8xf32>
    %223 = vector.multi_reduction <add>, %222, %cst_82 [2] : vector<2x8x8xf32> to vector<2x8xf32>
    %224 = vector.shape_cast %223 : vector<2x8xf32> to vector<2x8x1xf32>
    %225 = vector.broadcast %224 : vector<2x8x1xf32> to vector<2x8x8xf32>
    %226 = arith.divf %222, %225 : vector<2x8x8xf32>
    "tpu.trace_start"() <{level = 10 : i32, message = "bqk,bkd->bqd"}> : () -> ()
    %cst_83 = arith.constant dense<0.000000e+00> : vector<2x8x8xf32>
    %227 = tpu.matmul %226, %213, %cst_83 {dimension_numbers = #tpu.dot_dimension_numbers<[2], [1], [1], [2], [0, 0, 0, 1, 1, 2], [0], [0]>} : vector<2x8x8xf32>, vector<2x8x8xf32>, vector<2x8x8xf32> -> vector<2x8x8xf32>
    "tpu.trace_stop"() : () -> ()
    %228 = vector.shape_cast %227 : vector<2x8x8xf32> to vector<16x8xf32>
    %229 = tpu.concatenate %165, %186, %207, %228 in 1 : vector<16x8xf32>, vector<16x8xf32>, vector<16x8xf32>, vector<16x8xf32> -> vector<16x32xf32>
    %c1_84 = arith.constant 1 : index
    %c0_85 = arith.constant 0 : index
    %c0_86 = arith.constant 0 : index
    %230 = vector.load %arg7[%c1_84, %c0_85, %c0_86] : memref<2x32x32xf32, #tpu.memory_space<vmem>>, vector<1x32x32xf32>
    %231 = vector.shape_cast %230 : vector<1x32x32xf32> to vector<32x32xf32>
    %cst_87 = arith.constant dense<0.000000e+00> : vector<16x32xf32>
    %232 = tpu.matmul %229, %231, %cst_87 {dimension_numbers = #tpu.dot_dimension_numbers<[1], [0], [0], [1], [0, 0, 1, 1], [], []>} : vector<16x32xf32>, vector<32x32xf32>, vector<16x32xf32> -> vector<16x32xf32>
    %c1_88 = arith.constant 1 : index
    %c0_89 = arith.constant 0 : index
    %c0_90 = arith.constant 0 : index
    %233 = vector.load %arg8[%c1_88, %c0_89, %c0_90] : memref<2x1x32xf32, #tpu.memory_space<vmem>>, vector<1x1x32xf32>
    %234 = vector.shape_cast %233 : vector<1x1x32xf32> to vector<1x32xf32>
    %235 = vector.broadcast %234 : vector<1x32xf32> to vector<16x32xf32>
    %236 = arith.addf %232, %235 : vector<16x32xf32>
    %237 = arith.addf %236, %137 : vector<16x32xf32>
    %c1_91 = arith.constant 1 : index
    %c0_92 = arith.constant 0 : index
    %c0_93 = arith.constant 0 : index
    %238 = vector.load %arg9[%c1_91, %c0_92, %c0_93] : memref<2x32x32xf32, #tpu.memory_space<vmem>>, vector<1x32x32xf32>
    %239 = vector.shape_cast %238 : vector<1x32x32xf32> to vector<32x32xf32>
    %cst_94 = arith.constant dense<0.000000e+00> : vector<16x32xf32>
    %240 = tpu.matmul %237, %239, %cst_94 {dimension_numbers = #tpu.dot_dimension_numbers<[1], [0], [0], [1], [0, 0, 1, 1], [], []>} : vector<16x32xf32>, vector<32x32xf32>, vector<16x32xf32> -> vector<16x32xf32>
    %c1_95 = arith.constant 1 : index
    %c0_96 = arith.constant 0 : index
    %c0_97 = arith.constant 0 : index
    %241 = vector.load %arg10[%c1_95, %c0_96, %c0_97] : memref<2x1x32xf32, #tpu.memory_space<vmem>>, vector<1x1x32xf32>
    %242 = vector.shape_cast %241 : vector<1x1x32xf32> to vector<1x32xf32>
    %243 = vector.broadcast %242 : vector<1x32xf32> to vector<16x32xf32>
    %244 = arith.addf %240, %243 : vector<16x32xf32>
    %cst_98 = arith.constant 0.000000e+00 : f32
    %245 = vector.broadcast %cst_98 : f32 to vector<16x32xf32>
    %246 = arith.maximumf %244, %245 : vector<16x32xf32>
    %c1_99 = arith.constant 1 : index
    %c0_100 = arith.constant 0 : index
    %c0_101 = arith.constant 0 : index
    %247 = vector.load %arg11[%c1_99, %c0_100, %c0_101] : memref<2x32x32xf32, #tpu.memory_space<vmem>>, vector<1x32x32xf32>
    %248 = vector.shape_cast %247 : vector<1x32x32xf32> to vector<32x32xf32>
    %cst_102 = arith.constant dense<0.000000e+00> : vector<16x32xf32>
    %249 = tpu.matmul %246, %248, %cst_102 {dimension_numbers = #tpu.dot_dimension_numbers<[1], [0], [0], [1], [0, 0, 1, 1], [], []>} : vector<16x32xf32>, vector<32x32xf32>, vector<16x32xf32> -> vector<16x32xf32>
    %c1_103 = arith.constant 1 : index
    %c0_104 = arith.constant 0 : index
    %c0_105 = arith.constant 0 : index
    %250 = vector.load %arg12[%c1_103, %c0_104, %c0_105] : memref<2x1x32xf32, #tpu.memory_space<vmem>>, vector<1x1x32xf32>
    %251 = vector.shape_cast %250 : vector<1x1x32xf32> to vector<1x32xf32>
    %252 = vector.broadcast %251 : vector<1x32xf32> to vector<16x32xf32>
    %253 = arith.addf %249, %252 : vector<16x32xf32>
    %254 = arith.addf %253, %237 : vector<16x32xf32>
    %c0_106 = arith.constant 0 : index
    %c0_107 = arith.constant 0 : index
    %255 = vector.load %arg13[%c0_106, %c0_107] : memref<32x128xf32, #tpu.memory_space<vmem>>, vector<32x128xf32>
    %cst_108 = arith.constant dense<0.000000e+00> : vector<16x128xf32>
    %256 = tpu.matmul %254, %255, %cst_108 {dimension_numbers = #tpu.dot_dimension_numbers<[1], [0], [0], [1], [0, 0, 1, 1], [], []>} : vector<16x32xf32>, vector<32x128xf32>, vector<16x128xf32> -> vector<16x128xf32>
    %c0_109 = arith.constant 0 : index
    %c0_110 = arith.constant 0 : index
    %257 = vector.load %arg14[%c0_109, %c0_110] : memref<1x128xf32, #tpu.memory_space<vmem>>, vector<1x128xf32>
    %258 = vector.broadcast %257 : vector<1x128xf32> to vector<16x128xf32>
    %259 = arith.addf %256, %258 : vector<16x128xf32>
    %c0_111 = arith.constant 0 : index
    %c0_112 = arith.constant 0 : index
    %260 = vector.load %arg16[%c0_111, %c0_112] : memref<16x128xf32, #tpu.memory_space<vmem>>, vector<16x128xf32>
    tpu.vector_store %arg16[%c0_111, %c0_112], %259 {strides = array<i32>} : memref<16x128xf32, #tpu.memory_space<vmem>>, vector<16x128xf32>,
    %261 = tpu.iota {dimensions = array<i32: 1>} : vector<16x128xi32>
    %c4_i32 = arith.constant 4 : i32
    %262 = vector.broadcast %c4_i32 : i32 to vector<16x128xi32>
    %263 = arith.cmpi slt, %261, %262 : vector<16x128xi32>
    %cst_113 = arith.constant -1.000000e+30 : f32
    %264 = vector.broadcast %cst_113 : f32 to vector<16x128xf32>
    %265 = arith.select %263, %259, %264 : vector<16x128xi1>, vector<16x128xf32>
    %cst_114 = arith.constant dense<0xFF800000> : vector<16xf32>
    %266 = vector.multi_reduction <maximumf>, %265, %cst_114 [1] : vector<16x128xf32> to vector<16xf32>
    %267 = vector.shape_cast %266 : vector<16xf32> to vector<16x1xf32>
    %268 = vector.broadcast %267 : vector<16x1xf32> to vector<16x128xf32>
    %269 = arith.subf %265, %268 : vector<16x128xf32>
    %270 = math.exp %269 : vector<16x128xf32>
    %cst_115 = arith.constant dense<0.000000e+00> : vector<16xf32>
    %271 = vector.multi_reduction <add>, %270, %cst_115 [1] : vector<16x128xf32> to vector<16xf32>
    %272 = vector.shape_cast %271 : vector<16xf32> to vector<16x1xf32>
    %273 = vector.broadcast %272 : vector<16x1xf32> to vector<16x128xf32>
    %274 = arith.divf %270, %273 : vector<16x128xf32>
    %c0_116 = arith.constant 0 : index
    %c0_117 = arith.constant 0 : index
    %275 = vector.load %arg15[%c0_116, %c0_117] : memref<16x128xf32, #tpu.memory_space<vmem>>, vector<16x128xf32>
    tpu.vector_store %arg15[%c0_116, %c0_117], %274 {strides = array<i32>} : memref<16x128xf32, #tpu.memory_space<vmem>>, vector<16x128xf32>,
    return
  }
  func.func @transform_0(%arg0: i32) -> (i32, i32) {
    %c0_i32 = arith.constant 0 : i32
    %c0_i32_0 = arith.constant 0 : i32
    %c0_i32_1 = arith.constant 0 : i32
    return %c0_i32, %c0_i32_0 : i32, i32
  }
  func.func @transform_1(%arg0: i32) -> (i32, i32) {
    %c0_i32 = arith.constant 0 : i32
    %c0_i32_0 = arith.constant 0 : i32
    %c0_i32_1 = arith.constant 0 : i32
    return %c0_i32, %c0_i32_0 : i32, i32
  }
  func.func @transform_2(%arg0: i32) -> (i32, i32) {
    %c0_i32 = arith.constant 0 : i32
    %c0_i32_0 = arith.constant 0 : i32
    %c0_i32_1 = arith.constant 0 : i32
    return %c0_i32, %c0_i32_0 : i32, i32
  }
  func.func @transform_3(%arg0: i32) -> (i32, i32) {
    %c0_i32 = arith.constant 0 : i32
    %c0_i32_0 = arith.constant 0 : i32
    %c0_i32_1 = arith.constant 0 : i32
    return %c0_i32, %c0_i32_0 : i32, i32
  }
  func.func @transform_4(%arg0: i32) -> (i32, i32, i32) {
    %c0_i32 = arith.constant 0 : i32
    %c0_i32_0 = arith.constant 0 : i32
    %c0_i32_1 = arith.constant 0 : i32
    %c0_i32_2 = arith.constant 0 : i32
    return %c0_i32, %c0_i32_0, %c0_i32_1 : i32, i32, i32
  }
  func.func @transform_5(%arg0: i32) -> (i32, i32, i32) {
    %c0_i32 = arith.constant 0 : i32
    %c0_i32_0 = arith.constant 0 : i32
    %c0_i32_1 = arith.constant 0 : i32
    %c0_i32_2 = arith.constant 0 : i32
    return %c0_i32, %c0_i32_0, %c0_i32_1 : i32, i32, i32
  }
  func.func @transform_6(%arg0: i32) -> (i32, i32, i32) {
    %c0_i32 = arith.constant 0 : i32
    %c0_i32_0 = arith.constant 0 : i32
    %c0_i32_1 = arith.constant 0 : i32
    %c0_i32_2 = arith.constant 0 : i32
    return %c0_i32, %c0_i32_0, %c0_i32_1 : i32, i32, i32
  }
  func.func @transform_7(%arg0: i32) -> (i32, i32, i32) {
    %c0_i32 = arith.constant 0 : i32
    %c0_i32_0 = arith.constant 0 : i32
    %c0_i32_1 = arith.constant 0 : i32
    %c0_i32_2 = arith.constant 0 : i32
    return %c0_i32, %c0_i32_0, %c0_i32_1 : i32, i32, i32
  }
  func.func @transform_8(%arg0: i32) -> (i32, i32, i32) {
    %c0_i32 = arith.constant 0 : i32
    %c0_i32_0 = arith.constant 0 : i32
    %c0_i32_1 = arith.constant 0 : i32
    %c0_i32_2 = arith.constant 0 : i32
    return %c0_i32, %c0_i32_0, %c0_i32_1 : i32, i32, i32
  }
  func.func @transform_9(%arg0: i32) -> (i32, i32, i32) {
    %c0_i32 = arith.constant 0 : i32
    %c0_i32_0 = arith.constant 0 : i32
    %c0_i32_1 = arith.constant 0 : i32
    %c0_i32_2 = arith.constant 0 : i32
    return %c0_i32, %c0_i32_0, %c0_i32_1 : i32, i32, i32
  }
  func.func @transform_10(%arg0: i32) -> (i32, i32, i32) {
    %c0_i32 = arith.constant 0 : i32
    %c0_i32_0 = arith.constant 0 : i32
    %c0_i32_1 = arith.constant 0 : i32
    %c0_i32_2 = arith.constant 0 : i32
    return %c0_i32, %c0_i32_0, %c0_i32_1 : i32, i32, i32
  }
  func.func @transform_11(%arg0: i32) -> (i32, i32, i32) {
    %c0_i32 = arith.constant 0 : i32
    %c0_i32_0 = arith.constant 0 : i32
    %c0_i32_1 = arith.constant 0 : i32
    %c0_i32_2 = arith.constant 0 : i32
    return %c0_i32, %c0_i32_0, %c0_i32_1 : i32, i32, i32
  }
  func.func @transform_12(%arg0: i32) -> (i32, i32) {
    %c0_i32 = arith.constant 0 : i32
    %c0_i32_0 = arith.constant 0 : i32
    %c0_i32_1 = arith.constant 0 : i32
    return %c0_i32, %c0_i32_0 : i32, i32
  }
  func.func @transform_13(%arg0: i32) -> (i32, i32) {
    %c0_i32 = arith.constant 0 : i32
    %c0_i32_0 = arith.constant 0 : i32
    %c0_i32_1 = arith.constant 0 : i32
    return %c0_i32, %c0_i32_0 : i32, i32
  }
  func.func @transform_14(%arg0: i32) -> (i32, i32) {
    %c0_i32 = arith.constant 0 : i32
    %c0_i32_0 = arith.constant 0 : i32
    %c0_i32_1 = arith.constant 0 : i32
    return %c0_i32, %c0_i32_0 : i32, i32
  }
  func.func @transform_15(%arg0: i32) -> (i32, i32) {
    %c0_i32 = arith.constant 0 : i32
    %c0_i32_0 = arith.constant 0 : i32
    %c0_i32_1 = arith.constant 0 : i32
    return %c0_i32, %c0_i32_0 : i32, i32
  }
}

</mosaic_0001>

<bundles_post_ra>
// kernel: tpu_custom_call.1
= control target key start
LH: loop header
LB: loop body
LE: loop exit
PB: predicated region body
PF: predicated region fallthrough
CT: control target
= control target key end

     0   :  { %21 = vsyncpa [#allocation3], 0  ;;  %s5271_s0 = inlined_call_operand.vmem [shape: f32[16,4], index: 0, kind: input, shape index: {}]   ;;  %s5272_s1 = inlined_call_operand.vmem [shape: f32[4,32], index: 1, kind: input, shape index: {}]   ;;  %s5273_s2 = inlined_call_operand.vmem [shape: f32[1,32], index: 2, kind: input, shape index: {}]   ;;  %s5274_s3 = inlined_call_operand.vmem [shape: f32[8,32], index: 3, kind: input, shape index: {}]   ;;  %s5275_s4 = inlined_call_operand.hbm [shape: f32[2,32,96], index: 4, kind: input, shape index: {}]   ;;  %s5276_s5 = inlined_call_operand.vmem [shape: f32[2,1,96], index: 5, kind: input, shape index: {}]   ;;  %s5277_s6 = inlined_call_operand.hbm [shape: f32[2,32,32], index: 6, kind: input, shape index: {}]   ;;  %s5278_s7 = inlined_call_operand.vmem [shape: f32[2,1,32], index: 7, kind: input, shape index: {}]   ;;  %s5279_s8 = inlined_call_operand.hbm [shape: f32[2,32,32], index: 8, kind: input, shape index: {}]   ;;  %s5280_s9 = inlined_call_operand.vmem [shape: f32[2,1,32], index: 9, kind: input, shape index: {}]   ;;  %s5281_s10 = inlined_call_operand.hbm [shape: f32[2,32,32], index: 10, kind: input, shape index: {}]   ;;  %s5282_s11 = inlined_call_operand.vmem [shape: f32[2,1,32], index: 11, kind: input, shape index: {}]   ;;  %s5283_s12 = inlined_call_operand.vmem [shape: f32[32,128], index: 12, kind: input, shape index: {}]   ;;  %s5284_s13 = inlined_call_operand.vmem [shape: f32[1,128], index: 13, kind: input, shape index: {}]   ;;  %s5285_s14 = inlined_call_operand.hbm [shape: f32[16,128], index: 14, kind: output, shape index: {0}]   ;;  %s5286_s15 = inlined_call_operand.hbm [shape: f32[16,128], index: 15, kind: output, shape index: {1}]  }
   0x1   :  { %22 = vsyncpa [#allocation6], 0 }
   0x2   :  { %23 = vsyncpa [#allocation9], 0 }
   0x3   :  { %24 = vsyncpa [#allocation4], 0 }
   0x4   :  { %25 = vsyncpa [#allocation12], 0  ;;  %s4629_s18 = smov [#allocation5]   ;;  %s4630_s20 = smov [#allocation2]  }
   0x5   :  { %s53_s19 = sshll.u32 %s4629_s18, 4  ;;  %s39_s21 = sshll.u32 %s4630_s20, 4  ;;  %s54_s19 = int_to_ptr.vmem [resolvable:$true] %s53_s19  ;;  %s4733_s21 = int_to_ptr.vmem [resolvable:$true] %s39_s21 }
   0x6   :  { %s4487_s24 = scalar_lea.hbm %s5277_s6, 1024 }
   0x7   :  { %p4488_p0 = scmp.ne.s32.totalorder %s5277_s6, %s4487_s24  ;;  %p4491_p1 = scmp.lt.u32.totalorder %s4487_s24, %s5277_s6 }
   0x9   :  { %p4493_p2 = pnand %p4491_p1, %p4488_p0 }
   0xb   :  { %4496 = shalt.err (!%p4493_p2)
}
   0xc   :  { %s4497_s29 = scalar_lea.vmem %s54_s19, 1024  ;;  %p4502_p4 = scmp.lt.s32.totalorder %s54_s19, %s54_s19 }
   0xd   :  { %p4498_p3 = scmp.ne.s32.totalorder %s54_s19, %s4497_s29  ;;  %p4503_p5 = scmp.lt.s32.totalorder %s4497_s29, %s4497_s29 }
   0xf   :  { %p4504_p6 = por %p4503_p5, %p4502_p4 }
  0x11   :  { %p4505_p7 = pnand %p4504_p6, %p4498_p3 }
  0x13   :  { %4508 = shalt.err (!%p4505_p7)
}
  0x14   :  { %s4631_s30 = smov 128   ;;  %s4632_s16 = smov 8  }
  0x15   :  { %59 = dma.hbm_to_vmem [thread:$0]  %s5277_s6, 1024, %s54_s19, [#allocation6], %s4631_s30, %s4631_s30, %s4632_s16  }
  0x16   :  { %s4509_s23 = scalar_lea.hbm %s5275_s4, 1024 }
  0x17   :  { %p4510_p8 = scmp.ne.s32.totalorder %s5275_s4, %s4509_s23  ;;  %p4513_p9 = scmp.lt.u32.totalorder %s4509_s23, %s5275_s4 }
  0x19   :  { %p4515_p10 = pnand %p4513_p9, %p4510_p8 }
  0x1b   :  { %4518 = shalt.err (!%p4515_p10)
}
  0x1c   :  { %s4519_s28 = scalar_lea.vmem %s4733_s21, 1024  ;;  %p4524_p12 = scmp.lt.s32.totalorder %s4733_s21, %s4733_s21 }
  0x1d   :  { %p4520_p11 = scmp.ne.s32.totalorder %s4733_s21, %s4519_s28  ;;  %p4525_p13 = scmp.lt.s32.totalorder %s4519_s28, %s4519_s28 }
  0x1f   :  { %p4526_p0 = por %p4525_p13, %p4524_p12 }
  0x21   :  { %p4527_p1 = pnand %p4526_p0, %p4520_p11 }
  0x23   :  { %4530 = shalt.err (!%p4527_p1)
}
  0x24   :  { %45 = dma.hbm_to_vmem [thread:$0]  %s5275_s4, 1024, %s4733_s21, [#allocation3], %s4631_s30, %s4631_s30, %s4632_s16  }
  0x25   :  { %s4633_s29 = smov [#allocation7]   ;;  %s4634_s18 = smov [#allocation8]  }
  0x26   :  { %s67_s17 = sshll.u32 %s4633_s29, 4  ;;  %s81_s20 = sshll.u32 %s4634_s18, 4  ;;  %s68_s17 = int_to_ptr.vmem [resolvable:$true] %s67_s17  ;;  %s4770_s20 = int_to_ptr.vmem [resolvable:$true] %s81_s20 }
  0x27   :  { %s4531_s24 = scalar_lea.hbm %s5279_s8, 1024 }
  0x28   :  { %p4532_p2 = scmp.ne.s32.totalorder %s5279_s8, %s4531_s24  ;;  %p4535_p3 = scmp.lt.u32.totalorder %s4531_s24, %s5279_s8 }
  0x2a   :  { %p4537_p4 = pnand %p4535_p3, %p4532_p2 }
  0x2c   :  { %4540 = shalt.err (!%p4537_p4)
}
  0x2d   :  { %s4541_s4 = scalar_lea.vmem %s68_s17, 1024  ;;  %p4546_p6 = scmp.lt.s32.totalorder %s68_s17, %s68_s17 }
  0x2e   :  { %p4542_p5 = scmp.ne.s32.totalorder %s68_s17, %s4541_s4  ;;  %p4547_p7 = scmp.lt.s32.totalorder %s4541_s4, %s4541_s4 }
  0x30   :  { %p4548_p8 = por %p4547_p7, %p4546_p6 }
  0x32   :  { %p4549_p9 = pnand %p4548_p8, %p4542_p5 }
  0x34   :  { %4552 = shalt.err (!%p4549_p9)
}
  0x35   :  { %73 = dma.hbm_to_vmem [thread:$0]  %s5279_s8, 1024, %s68_s17, [#allocation6], %s4631_s30, %s4631_s30, %s4632_s16  }
  0x36   :  { %s4553_s18 = scalar_lea.hbm %s5281_s10, 1024 }
  0x37   :  { %p4554_p10 = scmp.ne.s32.totalorder %s5281_s10, %s4553_s18  ;;  %p4557_p11 = scmp.lt.u32.totalorder %s4553_s18, %s5281_s10 }
  0x39   :  { %p4559_p12 = pnand %p4557_p11, %p4554_p10 }
  0x3b   :  { %4562 = shalt.err (!%p4559_p12)
}
  0x3c   :  { %s4563_s26 = scalar_lea.vmem %s4770_s20, 1024  ;;  %p4568_p0 = scmp.lt.s32.totalorder %s4770_s20, %s4770_s20 }
  0x3d   :  { %p4564_p13 = scmp.ne.s32.totalorder %s4770_s20, %s4563_s26  ;;  %p4569_p1 = scmp.lt.s32.totalorder %s4563_s26, %s4563_s26 }
  0x3f   :  { %p4570_p2 = por %p4569_p1, %p4568_p0 }
  0x41   :  { %p4571_p3 = pnand %p4570_p2, %p4564_p13 }
  0x43   :  { %4574 = shalt.err (!%p4571_p3)
}
  0x44   :  { %87 = dma.hbm_to_vmem [thread:$0]  %s5281_s10, 1024, %s4770_s20, [#allocation9], %s4631_s30, %s4631_s30, %s4632_s16  }
  0x45   :  { %4619 = dma.done.wait [#allocation3], 1024  }
  0x46   :  { %4620 = vsyncadd [#allocation3], 4294966272 }
  0x47   :  { %4621 = dma.done.wait [#allocation6], 2048  }
  0x48   :  { %4622 = vsyncadd [#allocation6], 4294965248 }
  0x49   :  { %4623 = dma.done.wait [#allocation9], 1024  }
  0x4a   :  { %4624 = vsyncadd [#allocation9], 4294966272  ;;  %vm123_vm0 = vcmask 1043456   ;;  %vm116_vm1 = vcmask 31744   ;;  %v108_v0 = vld [vmem:[%s5272_s1] sm:$0xf]  ;;  %v205_v25 = vlaneseq }
  0x4b   :  { %v106_v1 = vld [vmem:[%s5271_s0] sm:$0xff]  ;;  %v107_v2 = vld [vmem:[%s5271_s0 + $0x8] sm:$0xff]  ;;  %4055 = vmatprep.subr.msk.mxu0 %vm123_vm0, %v108_v0  ;;  %v213_v6 = vld [vmem:[#allocation2 + $0x10] sm:$0xff]  ;;  %vm222_vm2 = vcmask 261120   ;;  %v4635_v17 = vmov 0.0   ;;  %vm4636_vm3 = vmmov 0  }
  0x4c   :  { %4057 = vmatprep.mubr.msk.f32.mxu0 %vm116_vm1, %v106_v1  ;;  %v211_v3 = vld [vmem:[#allocation2] sm:$0xff]  ;;  %v212_v4 = vld [vmem:[#allocation2 + $0x8] sm:$0xff]  ;;  %4056 = vmatpush3.msk.msra.mxu0 %vm123_vm0, %v108_v0  ;;  %v214_v7 = vld [vmem:[#allocation2 + $0x18] sm:$0xff]  ;;  %s4637_s29 = smov 96   ;;  %vm307_vm4 = vcmask 64512   ;;  %v206_v26 = vshrl.u32 %v205_v25, 7 }
  0x4d   :  { %v4319_v5 = vpack.c.bf16 %v212_v4, %v211_v3  ;;  %4058 = vmatmul.mubr.msk.f32.vlgmr.msra.gmra.mrb[0].mxu0 %vm116_vm1, %v107_v2  ;;  %v4323_v8 = vpack.c.bf16 %v214_v7, %v213_v6  ;;  %v3851_v9 = vld [vmem:[%s5273_s2] ss:$0 sm:$0xff]  ;;  %4071 = vmatprep.subr.mxu0 %v4635_v17  ;;  %v4859_v27 = vand.u32 127, %v205_v25  ;;  %v4638_v29 = vmov -1e+30   ;;  %s4639_s18 = smov 64  }
  0x4e   :  { %v202_v12 = vld [vmem:[%s5274_s3] sm:$0xff]  ;;  %4073 = vmatprep.mubr.msk.f32.mxu0 %vm4636_vm3, %v4635_v17  ;;  %s4640_s22 = smov 88   ;;  %s4641_s23 = smov 120   ;;  %vm1668_vm6 = vcmask 195584   ;;  %vm1665_vm7 = vcmask 130048  }
  0x4f   :  { %4320 = vmatprep.subr.bf16.mxu1 %v4319_v5  ;;  %v3855_v18 = vld [vmem:[%s5276_s5] ss:$0 sm:$0xff]  ;;  %vm209_vm5 = vcmp.le.s32.totalorder %v4859_v27, %v206_v26  ;;  %s4642_s24 = smov 56   ;;  %s4643_s25 = smov 80   ;;  %vm3793_vm8 = vcmp.lt.s32.totalorder %v4859_v27, 4 }
  0x50   :  { %4322 = vmatpush3.bf16.msra.mxu1 %v4319_v5  ;;  %v4862_v30 = vsel %vm209_vm5, 0.0, %v4638_v29  ;;  %s4644_s26 = smov 112   ;;  %s4645_s8 = smov 48  }
  0x51   :  { %4324 = vmatprep.subr.bf16.mxu1 %v4323_v8  ;;  %s4646_s17 = smov 72   ;;  %s4647_s27 = smov 104  }
  0x52   :  { %s4648_s28 = smov 40   ;;  %s4649_s4 = smov 16  }
  0x53   :  { %s4650_s21 = smov 24  }
  0x54   :  { %4326 = vmatpush3.bf16.msra.mxu1 %v4323_v8 }
  0x55   :  { %4081 = vmatprep.subr.mxu1 %v4635_v17 }
 0x120   :  { %v4059_v10 = vpop.f32.mrb[0].mxu0 }
 0x121   :  { %v199_v11 = vadd.f32 %v4059_v10, %v3851_v9  ;;  %v193_v13 = vpop.f32.mrb[1].mxu0 }
 0x122   :  { %v194_v14 = vadd.f32 %v3851_v9, %v193_v13 }
 0x123   :  { %v4824_v16 = vadd.f32 %v202_v12, %v199_v11 }
 0x124   :  { %v4822_v15 = vadd.f32 %v202_v12, %v194_v14 }
 0x126   :  { %4068 = vmatprep.mubr.msk.f32.mxu1 %vm222_vm2, %v4822_v15 }
 0x127   :  { %4069 = vmatmul.mubr.msk.f32.vlgmr.msra.gmra.mrb[0].mxu1 %vm222_vm2, %v4824_v16 }
 0x128   :  { %4083 = vmatprep.mubr.msk.f32.mxu1 %vm4636_vm3, %v4635_v17 }
 0x1fa   :  { %v4070_v19 = vpop.f32.mrb[0].mxu1 }
 0x1fb   :  { %v295_v20 = vpop.f32.mrb[1].mxu1  ;;  %v4843_v22 = vadd.f32 %v4070_v19, %v3855_v18 }
 0x1fc   :  { %v4839_v21 = vadd.f32 %v3855_v18, %v295_v20 }
 0x1fe   :  { %305 = vrot.lane.b32.xlu0 %v4839_v21, %s4637_s29 }
 0x202   :  { %383 = vrot.lane.b32.xlu0 %v4843_v22, %s4637_s29 }
 0x270   :  { %v306_v23 = vpop.permute.xlu0 %305 }
 0x271   :  { %4072 = vmatpush3.xpose.msk.msra.mxu0 %vm307_vm4, %v306_v23 }
 0x272   :  { %4076 = vmatprep.subr.mxu0 %v4635_v17 }
 0x274   :  { %4074 = vmatmul.mubr.msk.f32.vlgmr.msra.gmra.mrb[2].mxu0 %vm307_vm4, %v4839_v21  ;;  %v384_v24 = vpop.permute.xlu0 %383 }
 0x275   :  { %4077 = vmatpush3.xpose.msk.msra.mxu0 %vm307_vm4, %v384_v24  ;;  %4078 = vmatprep.mubr.msk.f32.mxu0 %vm4636_vm3, %v4635_v17 }
 0x276   :  { %4086 = vmatprep.subr.mxu0 %v4635_v17 }
 0x278   :  { %4079 = vmatmul.mubr.msk.f32.vlgmr.msra.gmra.mrb[4].mxu0 %vm307_vm4, %v4843_v22 }
 0x279   :  { %4088 = vmatprep.mubr.msk.f32.mxu0 %vm4636_vm3, %v4635_v17 }
 0x347   :  { %v378_v28 = vpop.f32.mrb[2].mxu0 }
 0x348   :  { %v459_v31 = vmul.f32 0.35355338, %v378_v28  ;;  %v4075_v32 = vpop.f32.mrb[3].mxu0 }
 0x34a   :  { %v461_v33 = vadd.f32 %v459_v31, %v4862_v30 }
 0x34b   :  { %v455_v34 = vpop.f32.mrb[4].mxu0 }
 0x34c   :  { %v460_v35 = vmul.f32 0.35355338, %v455_v34  ;;  %v4080_v36 = vpop.f32.mrb[5].mxu0  ;;  %v463_v37 = vsel %vm307_vm4, %v461_v33, -inf }
 0x34d   :  { %464 = vmax.xlane.f32.xlu1 %v463_v37 }
 0x34e   :  { %v462_v38 = vadd.f32 %v460_v35, %v4862_v30 }
 0x350   :  { %v466_v39 = vsel %vm307_vm4, %v462_v38, -inf }
 0x351   :  { %467 = vmax.xlane.f32.xlu1 %v466_v39 }
 0x362   :  { %485 = vrot.lane.b32.xlu1 %v4839_v21, %s4639_s18 }
 0x366   :  { %561 = vrot.lane.b32.xlu1 %v4843_v22, %s4639_s18 }
 0x36a   :  { %639 = vrot.lane.b32.xlu1 %v4839_v21, %s4640_s22 }
 0x36e   :  { %717 = vrot.lane.b32.xlu1 %v4843_v22, %s4640_s22 }
 0x3da   :  { %v465_v40 = vpop.xlane.xlu1 %464 }
 0x3db   :  { %v469_v41 = vsub.f32 %v461_v33, %v465_v40 }
 0x3dd   :  { %v471_v42 = vmul.f32 1.442695, %v469_v41 }
 0x3de   :  { %v468_v43 = vpop.xlane.xlu1 %467 }
 0x3df   :  { %4415 = vpow2.f32 %v471_v42  ;;  %v470_v44 = vsub.f32 %v462_v38, %v468_v43 }
 0x3e1   :  { %v473_v45 = vmul.f32 1.442695, %v470_v44 }
 0x3e2   :  { %v486_v46 = vpop.permute.xlu1 %485 }
 0x3e3   :  { %4417 = vpow2.f32 %v473_v45  ;;  %4082 = vmatpush3.msra.mxu1 %v486_v46 }
 0x3e4   :  { %4091 = vmatprep.subr.mxu1 %v4635_v17 }
 0x3e6   :  { %v562_v47 = vpop.permute.xlu1 %561 }
 0x3e7   :  { %4087 = vmatpush3.msra.mxu0 %v562_v47 }
 0x3e8   :  { %4096 = vmatprep.subr.mxu0 %v4635_v17 }
 0x3e9   :  { %v4416_v48 = vpop.eup %4415 }
 0x3ea   :  { %v475_v49 = vsel %vm307_vm4, %v4416_v48, 0.0  ;;  %v640_v52 = vpop.permute.xlu1 %639 }
 0x3eb   :  { %476 = vadd.xlane.f32.xlu0 %v475_v49 }
 0x3ed   :  { %v4418_v50 = vpop.eup %4417 }
 0x3ee   :  { %v478_v51 = vsel %vm307_vm4, %v4418_v50, 0.0  ;;  %v718_v53 = vpop.permute.xlu1 %717 }
 0x3ef   :  { %479 = vadd.xlane.f32.xlu1 %v478_v51 }
 0x400   :  { %715 = vrot.lane.b32.xlu1 %v4843_v22, %s4641_s23 }
 0x401   :  { %637 = vrot.lane.b32.xlu0 %v4839_v21, %s4641_s23 }
 0x478   :  { %v477_v54 = vpop.xlane.xlu0 %476 }
 0x479   :  { %4419 = vrcp.f32 %v477_v54 }
 0x47c   :  { %v480_v55 = vpop.xlane.xlu1 %479  ;;  %v638_v60 = vpop.permute.xlu0 %637 }
 0x47d   :  { %4421 = vrcp.f32 %v480_v55 }
 0x480   :  { %v716_v61 = vpop.permute.xlu1 %715 }
 0x483   :  { %v4420_v56 = vpop.eup %4419 }
 0x484   :  { %v482_v57 = vmul.f32 %v4420_v56, %v4416_v48 }
 0x486   :  { %4084 = vmatmul.mubr.msk.f32.vlgmr.msra.gmra.mrb[2].mxu1 %vm307_vm4, %v482_v57 }
 0x487   :  { %v4422_v58 = vpop.eup %4421  ;;  %4092 = vmatpush3.xpose.msk.msra.mxu1 %vm307_vm4, %v640_v52  ;;  %4093 = vmatprep.mubr.msk.f32.mxu1 %vm4636_vm3, %v4635_v17 }
 0x488   :  { %v484_v59 = vmul.f32 %v4422_v58, %v4418_v50  ;;  %4101 = vmatprep.subr.mxu1 %v4635_v17 }
 0x48a   :  { %4089 = vmatmul.mubr.msk.f32.vlgmr.msra.gmra.mrb[6].mxu0 %vm307_vm4, %v484_v59  ;;  %4094 = vmatmul.mubr.msk.f32.vlgmr.msra.gmra.mrb[4].mxu1 %vm307_vm4, %v638_v60 }
 0x48b   :  { %4097 = vmatpush3.xpose.msk.msra.mxu0 %vm307_vm4, %v718_v53  ;;  %4098 = vmatprep.mubr.msk.f32.mxu0 %vm4636_vm3, %v4635_v17 }
 0x48c   :  { %4106 = vmatprep.subr.mxu0 %v4635_v17  ;;  %4103 = vmatprep.mubr.msk.f32.mxu1 %vm4636_vm3, %v4635_v17 }
 0x48e   :  { %4099 = vmatmul.mubr.msk.f32.vlgmr.msra.gmra.mrb[8].mxu0 %vm307_vm4, %v716_v61 }
 0x48f   :  { %4108 = vmatprep.mubr.msk.f32.mxu0 %vm4636_vm3, %v4635_v17 }
 0x559   :  { %v4900_v62 = vpop.f32.mrb[2].mxu1 }
 0x55a   :  { %v4085_v63 = vpop.f32.mrb[3].mxu1 }
 0x55d   :  { %v4902_v0 = vpop.f32.mrb[6].mxu0  ;;  %v711_v1 = vpop.f32.mrb[4].mxu1 }
 0x55e   :  { %v793_v2 = vmul.f32 0.35355338, %v711_v1  ;;  %v4090_v3 = vpop.f32.mrb[7].mxu0  ;;  %v4095_v4 = vpop.f32.mrb[5].mxu1 }
 0x560   :  { %v795_v5 = vadd.f32 %v793_v2, %v4862_v30 }
 0x561   :  { %v789_v6 = vpop.f32.mrb[8].mxu0 }
 0x562   :  { %v794_v7 = vmul.f32 0.35355338, %v789_v6  ;;  %v4100_v8 = vpop.f32.mrb[9].mxu0  ;;  %v797_v9 = vsel %vm307_vm4, %v795_v5, -inf }
 0x563   :  { %798 = vmax.xlane.f32.xlu1 %v797_v9 }
 0x564   :  { %v796_v10 = vadd.f32 %v794_v7, %v4862_v30 }
 0x566   :  { %v800_v11 = vsel %vm307_vm4, %v796_v10, -inf }
 0x567   :  { %801 = vmax.xlane.f32.xlu0 %v800_v11 }
 0x574   :  { %819 = vrot.lane.b32.xlu1 %v4839_v21, %s4642_s24 }
 0x578   :  { %973 = vrot.lane.b32.xlu1 %v4839_v21, %s4643_s25 }
 0x57c   :  { %1051 = vrot.lane.b32.xlu1 %v4843_v22, %s4643_s25 }
 0x57d   :  { %895 = vrot.lane.b32.xlu0 %v4843_v22, %s4642_s24 }
 0x581   :  { %971 = vrot.lane.b32.xlu0 %v4839_v21, %s4644_s26 }
 0x5f0   :  { %v799_v12 = vpop.xlane.xlu1 %798 }
 0x5f1   :  { %v803_v13 = vsub.f32 %v795_v5, %v799_v12 }
 0x5f3   :  { %v805_v14 = vmul.f32 1.442695, %v803_v13 }
 0x5f4   :  { %v820_v18 = vpop.permute.xlu1 %819  ;;  %v802_v19 = vpop.xlane.xlu0 %801 }
 0x5f5   :  { %4423 = vpow2.f32 %v805_v14  ;;  %v804_v20 = vsub.f32 %v796_v10, %v802_v19  ;;  %4102 = vmatpush3.msra.mxu1 %v820_v18 }
 0x5f6   :  { %4111 = vmatprep.subr.mxu1 %v4635_v17 }
 0x5f7   :  { %v807_v23 = vmul.f32 1.442695, %v804_v20 }
 0x5f8   :  { %v896_v24 = vpop.permute.xlu0 %895  ;;  %v974_v31 = vpop.permute.xlu1 %973 }
 0x5f9   :  { %4425 = vpow2.f32 %v807_v23  ;;  %4107 = vmatpush3.msra.mxu0 %v896_v24 }
 0x5fa   :  { %4116 = vmatprep.subr.mxu0 %v4635_v17 }
 0x5fc   :  { %v1052_v32 = vpop.permute.xlu1 %1051  ;;  %v972_v39 = vpop.permute.xlu0 %971 }
 0x5ff   :  { %v4424_v25 = vpop.eup %4423 }
 0x600   :  { %v809_v26 = vsel %vm307_vm4, %v4424_v25, 0.0 }
 0x601   :  { %810 = vadd.xlane.f32.xlu1 %v809_v26 }
 0x603   :  { %v4426_v28 = vpop.eup %4425 }
 0x604   :  { %v812_v29 = vsel %vm307_vm4, %v4426_v28, 0.0 }
 0x605   :  { %813 = vadd.xlane.f32.xlu1 %v812_v29 }
 0x616   :  { %1049 = vrot.lane.b32.xlu1 %v4843_v22, %s4644_s26 }
 0x68e   :  { %v811_v33 = vpop.xlane.xlu1 %810 }
 0x68f   :  { %4427 = vrcp.f32 %v811_v33 }
 0x692   :  { %v814_v34 = vpop.xlane.xlu1 %813 }
 0x693   :  { %4429 = vrcp.f32 %v814_v34 }
 0x696   :  { %v1050_v40 = vpop.permute.xlu1 %1049 }
 0x699   :  { %v4428_v35 = vpop.eup %4427 }
 0x69a   :  { %v816_v36 = vmul.f32 %v4428_v35, %v4424_v25 }
 0x69c   :  { %4104 = vmatmul.mubr.msk.f32.vlgmr.msra.gmra.mrb[6].mxu1 %vm307_vm4, %v816_v36 }
 0x69d   :  { %v4430_v37 = vpop.eup %4429  ;;  %4112 = vmatpush3.xpose.msk.msra.mxu1 %vm307_vm4, %v974_v31  ;;  %4113 = vmatprep.mubr.msk.f32.mxu1 %vm4636_vm3, %v4635_v17 }
 0x69e   :  { %v818_v38 = vmul.f32 %v4430_v37, %v4426_v28  ;;  %4121 = vmatprep.subr.mxu1 %v4635_v17 }
 0x6a0   :  { %4109 = vmatmul.mubr.msk.f32.vlgmr.msra.gmra.mrb[10].mxu0 %vm307_vm4, %v818_v38  ;;  %4114 = vmatmul.mubr.msk.f32.vlgmr.msra.gmra.mrb[8].mxu1 %vm307_vm4, %v972_v39 }
 0x6a1   :  { %4117 = vmatpush3.xpose.msk.msra.mxu0 %vm307_vm4, %v1052_v32  ;;  %4118 = vmatprep.mubr.msk.f32.mxu0 %vm4636_vm3, %v4635_v17 }
 0x6a2   :  { %4126 = vmatprep.subr.mxu0 %v4635_v17  ;;  %4123 = vmatprep.mubr.msk.f32.mxu1 %vm4636_vm3, %v4635_v17 }
 0x6a4   :  { %4119 = vmatmul.mubr.msk.f32.vlgmr.msra.gmra.mrb[12].mxu0 %vm307_vm4, %v1050_v40 }
 0x6a5   :  { %4128 = vmatprep.mubr.msk.f32.mxu0 %vm4636_vm3, %v4635_v17 }
 0x76f   :  { %v4940_v41 = vpop.f32.mrb[6].mxu1 }
 0x770   :  { %v4105_v42 = vpop.f32.mrb[7].mxu1 }
 0x773   :  { %v4942_v43 = vpop.f32.mrb[10].mxu0  ;;  %v1045_v44 = vpop.f32.mrb[8].mxu1 }
 0x774   :  { %v1127_v45 = vmul.f32 0.35355338, %v1045_v44  ;;  %v4110_v46 = vpop.f32.mrb[11].mxu0  ;;  %v4115_v47 = vpop.f32.mrb[9].mxu1 }
 0x776   :  { %v1129_v48 = vadd.f32 %v1127_v45, %v4862_v30 }
 0x777   :  { %v1123_v49 = vpop.f32.mrb[12].mxu0 }
 0x778   :  { %v1128_v50 = vmul.f32 0.35355338, %v1123_v49  ;;  %v4120_v51 = vpop.f32.mrb[13].mxu0  ;;  %v1131_v52 = vsel %vm307_vm4, %v1129_v48, -inf }
 0x779   :  { %1132 = vmax.xlane.f32.xlu0 %v1131_v52 }
 0x77a   :  { %v1130_v53 = vadd.f32 %v1128_v50, %v4862_v30 }
 0x77c   :  { %v1134_v54 = vsel %vm307_vm4, %v1130_v53, -inf }
 0x77d   :  { %1135 = vmax.xlane.f32.xlu1 %v1134_v54  ;;  %v1672_v54 = vld [vmem:[#allocation5 + $0x8] sm:$0xff] }
 0x78e   :  { %1153 = vrot.lane.b32.xlu1 %v4839_v21, %s4645_s8 }
 0x78f   :  { %1229 = vrot.lane.b32.xlu0 %v4843_v22, %s4645_s8 }
 0x792   :  { %1307 = vrot.lane.b32.xlu1 %v4839_v21, %s4646_s17 }
 0x796   :  { %1385 = vrot.lane.b32.xlu1 %v4843_v22, %s4646_s17 }
 0x79a   :  { %1383 = vrot.lane.b32.xlu1 %v4843_v22, %s4647_s27 }
 0x806   :  { %v1133_v55 = vpop.xlane.xlu0 %1132 }
 0x807   :  { %v1137_v56 = vsub.f32 %v1129_v48, %v1133_v55 }
 0x809   :  { %v1139_v57 = vmul.f32 1.442695, %v1137_v56  ;;  %v1674_v56 = vld [vmem:[#allocation5 + $0x18] sm:$0xff] }
 0x80a   :  { %v1136_v58 = vpop.xlane.xlu1 %1135  ;;  %v1230_v59 = vpop.permute.xlu0 %1229 }
 0x80b   :  { %4431 = vpow2.f32 %v1139_v57  ;;  %v1138_v60 = vsub.f32 %v1130_v53, %v1136_v58  ;;  %4127 = vmatpush3.msra.mxu0 %v1230_v59  ;;  %v1671_v53 = vld [vmem:[#allocation5] sm:$0xff]  ;;  %v1766_v59 = vld [vmem:[#allocation7 + $0x8] sm:$0xff] }
 0x80c   :  { %4136 = vmatprep.subr.mxu0 %v4635_v17  ;;  %v4327_v55 = vpack.c.bf16 %v1672_v54, %v1671_v53  ;;  %v1765_v58 = vld [vmem:[#allocation7] sm:$0xff] }
 0x80d   :  { %v1141_v61 = vmul.f32 1.442695, %v1138_v60  ;;  %v4335_v60 = vpack.c.bf16 %v1766_v59, %v1765_v58  ;;  %v3892_v53 = vld [vmem:[%s5276_s5 + $0x1] ss:$0 sm:$0xff] }
 0x80e   :  { %v1154_v63 = vpop.permute.xlu1 %1153 }
 0x80f   :  { %4433 = vpow2.f32 %v1141_v61  ;;  %4122 = vmatpush3.msra.mxu1 %v1154_v63 }
 0x810   :  { %4131 = vmatprep.subr.mxu1 %v4635_v17 }
 0x812   :  { %v1308_v7 = vpop.permute.xlu1 %1307 }
 0x815   :  { %v4432_v1 = vpop.eup %4431 }
 0x816   :  { %v1143_v2 = vsel %vm307_vm4, %v4432_v1, 0.0  ;;  %v1386_v11 = vpop.permute.xlu1 %1385 }
 0x817   :  { %1144 = vadd.xlane.f32.xlu0 %v1143_v2 }
 0x819   :  { %v4434_v3 = vpop.eup %4433 }
 0x81a   :  { %v1146_v4 = vsel %vm307_vm4, %v4434_v3, 0.0  ;;  %v1384_v14 = vpop.permute.xlu1 %1383 }
 0x81b   :  { %1147 = vadd.xlane.f32.xlu0 %v1146_v4 }
 0x831   :  { %1305 = vrot.lane.b32.xlu0 %v4839_v21, %s4647_s27 }
 0x8a4   :  { %v1145_v5 = vpop.xlane.xlu0 %1144 }
 0x8a5   :  { %4435 = vrcp.f32 %v1145_v5 }
 0x8a8   :  { %v1148_v6 = vpop.xlane.xlu0 %1147 }
 0x8a9   :  { %4437 = vrcp.f32 %v1148_v6 }
 0x8ac   :  { %v1306_v13 = vpop.permute.xlu0 %1305 }
 0x8af   :  { %v4436_v8 = vpop.eup %4435 }
 0x8b0   :  { %v1150_v9 = vmul.f32 %v4436_v8, %v4432_v1 }
 0x8b2   :  { %4124 = vmatmul.mubr.msk.f32.vlgmr.msra.gmra.mrb[10].mxu1 %vm307_vm4, %v1150_v9 }
 0x8b3   :  { %v4438_v10 = vpop.eup %4437  ;;  %4132 = vmatpush3.xpose.msk.msra.mxu1 %vm307_vm4, %v1308_v7  ;;  %4133 = vmatprep.mubr.msk.f32.mxu1 %vm4636_vm3, %v4635_v17 }
 0x8b4   :  { %v1152_v12 = vmul.f32 %v4438_v10, %v4434_v3  ;;  %4141 = vmatprep.subr.mxu1 %v4635_v17 }
 0x8b6   :  { %4129 = vmatmul.mubr.msk.f32.vlgmr.msra.gmra.mrb[14].mxu0 %vm307_vm4, %v1152_v12  ;;  %4134 = vmatmul.mubr.msk.f32.vlgmr.msra.gmra.mrb[12].mxu1 %vm307_vm4, %v1306_v13 }
 0x8b7   :  { %4137 = vmatpush3.xpose.msk.msra.mxu0 %vm307_vm4, %v1386_v11  ;;  %4138 = vmatprep.mubr.msk.f32.mxu0 %vm4636_vm3, %v4635_v17 }
 0x8b8   :  { %4146 = vmatprep.subr.mxu0 %v4635_v17  ;;  %4143 = vmatprep.mubr.msk.f32.mxu1 %vm4636_vm3, %v4635_v17 }
 0x8ba   :  { %4139 = vmatmul.mubr.msk.f32.vlgmr.msra.gmra.mrb[16].mxu0 %vm307_vm4, %v1384_v14 }
 0x8bb   :  { %4148 = vmatprep.mubr.msk.f32.mxu0 %vm4636_vm3, %v4635_v17 }
 0x985   :  { %v1225_v18 = vpop.f32.mrb[10].mxu1 }
 0x986   :  { %v4125_v19 = vpop.f32.mrb[11].mxu1 }
 0x989   :  { %v1301_v20 = vpop.f32.mrb[14].mxu0  ;;  %v1379_v23 = vpop.f32.mrb[12].mxu1 }
 0x98a   :  { %v1461_v24 = vmul.f32 0.35355338, %v1379_v23  ;;  %v4130_v25 = vpop.f32.mrb[15].mxu0  ;;  %v4135_v26 = vpop.f32.mrb[13].mxu1  ;;  %v1860_v23 = vld [vmem:[#allocation8 + $0x8] sm:$0xff] }
 0x98c   :  { %v1463_v28 = vadd.f32 %v1461_v24, %v4862_v30 }
 0x98d   :  { %v1457_v29 = vpop.f32.mrb[16].mxu0 }
 0x98e   :  { %v1462_v31 = vmul.f32 0.35355338, %v1457_v29  ;;  %v4140_v32 = vpop.f32.mrb[17].mxu0  ;;  %v1465_v33 = vsel %vm307_vm4, %v1463_v28, -inf }
 0x98f   :  { %1466 = vmax.xlane.f32.xlu0 %v1465_v33  ;;  %v1861_v33 = vld [vmem:[#allocation8 + $0x10] sm:$0xff] }
 0x990   :  { %v1464_v34 = vadd.f32 %v1462_v31, %v4862_v30 }
 0x992   :  { %v1468_v35 = vsel %vm307_vm4, %v1464_v34, -inf }
 0x993   :  { %1469 = vmax.xlane.f32.xlu1 %v1468_v35 }
 0x9a4   :  { %1487 = vrot.lane.b32.xlu1 %v4839_v21, %s4648_s28 }
 0x9a8   :  { %1641 = vrot.lane.b32.xlu1 %v4940_v41, %s4632_s16 }
 0x9ac   :  { %1643 = vrot.lane.b32.xlu1 %v4942_v43, %s4632_s16 }
 0x9b0   :  { %1651 = vrot.lane.b32.xlu1 %v1301_v20, %s4649_s4  ;;  %v1859_v20 = vld [vmem:[#allocation8] sm:$0xff] }
 0x9b1   :  { %v4343_v24 = vpack.c.bf16 %v1860_v23, %v1859_v20 }
 0xa1c   :  { %v1467_v36 = vpop.xlane.xlu0 %1466 }
 0xa1d   :  { %v1471_v37 = vsub.f32 %v1463_v28, %v1467_v36  ;;  %v1954_v36 = vld [vmem:[#allocation2 + $0x20] sm:$0xff] }
 0xa1f   :  { %v1473_v38 = vmul.f32 1.442695, %v1471_v37  ;;  %v1955_v37 = vld [vmem:[#allocation2 + $0x28] sm:$0xff] }
 0xa20   :  { %v1470_v39 = vpop.xlane.xlu1 %1469 }
 0xa21   :  { %4439 = vpow2.f32 %v1473_v38  ;;  %v1472_v40 = vsub.f32 %v1464_v34, %v1470_v39  ;;  %v1862_v34 = vld [vmem:[#allocation8 + $0x18] sm:$0xff]  ;;  %v4351_v38 = vpack.c.bf16 %v1955_v37, %v1954_v36 }
 0xa22   :  { %v4347_v35 = vpack.c.bf16 %v1862_v34, %v1861_v33 }
 0xa23   :  { %v1475_v42 = vmul.f32 1.442695, %v1472_v40 }
 0xa24   :  { %v1488_v44 = vpop.permute.xlu1 %1487 }
 0xa25   :  { %4441 = vpow2.f32 %v1475_v42  ;;  %4142 = vmatpush3.msra.mxu1 %v1488_v44 }
 0xa26   :  { %4328 = vmatprep.subr.bf16.mxu1 %v4327_v55 }
 0xa28   :  { %v1642_v3 = vpop.permute.xlu1 %1641 }
 0xa29   :  { %v1663_v6 = vsel %vm307_vm4, %v4900_v62, %v1642_v3  ;;  %v1767_v62 = vld [vmem:[#allocation7 + $0x10] sm:$0xff] }
 0xa2b   :  { %v4440_v21 = vpop.eup %4439 }
 0xa2c   :  { %v1477_v45 = vsel %vm307_vm4, %v4440_v21, 0.0  ;;  %v1644_v4 = vpop.permute.xlu1 %1643 }
 0xa2d   :  { %1478 = vadd.xlane.f32.xlu0 %v1477_v45  ;;  %v1664_v11 = vsel %vm307_vm4, %v4902_v0, %v1644_v4  ;;  %v3882_v0 = vld [vmem:[%s5278_s7] ss:$0 sm:$0xff]  ;;  %v1956_v45 = vld [vmem:[#allocation2 + $0x30] sm:$0xff] }
 0xa2f   :  { %v4442_v41 = vpop.eup %4441 }
 0xa30   :  { %v1480_v43 = vsel %vm307_vm4, %v4442_v41, 0.0  ;;  %v1652_v7 = vpop.permute.xlu1 %1651 }
 0xa31   :  { %1481 = vadd.xlane.f32.xlu0 %v1480_v43  ;;  %v1667_v12 = vsel %vm1665_vm7, %v1664_v11, %v1652_v7 }
 0xa47   :  { %1563 = vrot.lane.b32.xlu0 %v4843_v22, %s4648_s28  ;;  %v1673_v22 = vld [vmem:[#allocation5 + $0x10] sm:$0xff] }
 0xa48   :  { %v4331_v57 = vpack.c.bf16 %v1674_v56, %v1673_v22 }
 0xa4b   :  { %1649 = vrot.lane.b32.xlu0 %v1225_v18, %s4649_s4  ;;  %v1768_v18 = vld [vmem:[#allocation7 + $0x18] sm:$0xff] }
 0xa4c   :  { %v4339_v19 = vpack.c.bf16 %v1768_v18, %v1767_v62 }
 0xaba   :  { %v1479_v46 = vpop.xlane.xlu0 %1478 }
 0xabb   :  { %4443 = vrcp.f32 %v1479_v46  ;;  %v3888_v46 = vld [vmem:[%s5282_s11] ss:$0 sm:$0xff] }
 0xabe   :  { %v1482_v47 = vpop.xlane.xlu0 %1481 }
 0xabf   :  { %4445 = vrcp.f32 %v1482_v47 }
 0xac2   :  { %v1564_v48 = vpop.permute.xlu0 %1563 }
 0xac3   :  { %4147 = vmatpush3.msra.mxu0 %v1564_v48 }
 0xac4   :  { %4336 = vmatprep.subr.bf16.mxu0 %v4335_v60 }
 0xac5   :  { %v4444_v49 = vpop.eup %4443 }
 0xac6   :  { %v1484_v50 = vmul.f32 %v4444_v49, %v4440_v21  ;;  %v1650_v5 = vpop.permute.xlu0 %1649 }
 0xac7   :  { %v1666_v8 = vsel %vm1665_vm7, %v1663_v6, %v1650_v5 }
 0xac8   :  { %4144 = vmatmul.mubr.msk.f32.vlgmr.msra.gmra.mrb[14].mxu1 %vm307_vm4, %v1484_v50 }
 0xac9   :  { %v4446_v51 = vpop.eup %4445  ;;  %4330 = vmatpush3.bf16.msra.mxu1 %v4327_v55 }
 0xaca   :  { %v1486_v52 = vmul.f32 %v4446_v51, %v4442_v41  ;;  %4332 = vmatprep.subr.bf16.mxu1 %v4331_v57  ;;  %v1957_v41 = vld [vmem:[#allocation2 + $0x38] sm:$0xff] }
 0xacb   :  { %v4355_v43 = vpack.c.bf16 %v1957_v41, %v1956_v45 }
 0xacc   :  { %4149 = vmatmul.mubr.msk.f32.vlgmr.msra.gmra.mrb[18].mxu0 %vm307_vm4, %v1486_v52 }
 0xacd   :  { %4334 = vmatpush3.bf16.msra.mxu1 %v4331_v57  ;;  %4338 = vmatpush3.bf16.msra.mxu0 %v4335_v60 }
 0xace   :  { %4340 = vmatprep.subr.bf16.mxu0 %v4339_v19  ;;  %4344 = vmatprep.subr.bf16.mxu1 %v4343_v24 }
 0xad1   :  { %4342 = vmatpush3.bf16.msra.mxu0 %v4339_v19 }
 0xad2   :  { %4352 = vmatprep.subr.bf16.mxu0 %v4351_v38 }
 0xb9b   :  { %v1559_v61 = vpop.f32.mrb[14].mxu1 }
 0xb9c   :  { %1657 = vrot.lane.b32.xlu0 %v1559_v61, %s4650_s21  ;;  %v4145_v63 = vpop.f32.mrb[15].mxu1 }
 0xb9f   :  { %v1635_v1 = vpop.f32.mrb[18].mxu0 }
 0xba0   :  { %1659 = vrot.lane.b32.xlu1 %v1635_v1, %s4650_s21  ;;  %v4150_v2 = vpop.f32.mrb[19].mxu0 }
 0xc0e   :  { %v1658_v9 = vpop.permute.xlu0 %1657 }
 0xc0f   :  { %v1669_v10 = vsel %vm1668_vm6, %v1666_v8, %v1658_v9 }
 0xc10   :  { %4159 = vmatprep.mubr.msk.f32.mxu1 %vm222_vm2, %v1669_v10 }
 0xc12   :  { %v1660_v13 = vpop.permute.xlu1 %1659 }
 0xc13   :  { %v1670_v14 = vsel %vm1668_vm6, %v1667_v12, %v1660_v13 }
 0xc14   :  { %4160 = vmatmul.mubr.msk.f32.vlgmr.msra.gmra.mrb[16].mxu1 %vm222_vm2, %v1670_v14 }
 0xc15   :  { %4346 = vmatpush3.bf16.msra.mxu1 %v4343_v24 }
 0xc16   :  { %4348 = vmatprep.subr.bf16.mxu1 %v4347_v35 }
 0xc19   :  { %4350 = vmatpush3.bf16.msra.mxu1 %v4347_v35 }
 0xc1a   :  { %4195 = vmatprep.subr.mxu1 %v4635_v17 }
 0xce7   :  { %v4161_v25 = vpop.f32.mrb[16].mxu1 }
 0xce8   :  { %v1760_v26 = vadd.f32 %v4161_v25, %v3882_v0  ;;  %v1754_v28 = vpop.f32.mrb[17].mxu1 }
 0xce9   :  { %v1755_v29 = vadd.f32 %v3882_v0, %v1754_v28 }
 0xcea   :  { %v1764_v32 = vadd.f32 %v1760_v26, %v4824_v16 }
 0xceb   :  { %v1763_v31 = vadd.f32 %v1755_v29, %v4822_v15  ;;  %v3885_v15 = vld [vmem:[%s5280_s9] ss:$0 sm:$0xff] }
 0xced   :  { %4170 = vmatprep.mubr.msk.f32.mxu0 %vm222_vm2, %v1763_v31 }
 0xcee   :  { %4171 = vmatmul.mubr.msk.f32.vlgmr.msra.gmra.mrb[20].mxu0 %vm222_vm2, %v1764_v32 }
 0xcef   :  { %4354 = vmatpush3.bf16.msra.mxu0 %v4351_v38 }
 0xcf0   :  { %4356 = vmatprep.subr.bf16.mxu0 %v4355_v43 }
 0xcf3   :  { %4358 = vmatpush3.bf16.msra.mxu0 %v4355_v43 }
 0xcf4   :  { %4200 = vmatprep.subr.mxu0 %v4635_v17 }
 0xdc1   :  { %v4172_v16 = vpop.f32.mrb[20].mxu0 }
 0xdc2   :  { %v1854_v39 = vadd.f32 %v4172_v16, %v3885_v15  ;;  %v1848_v40 = vpop.f32.mrb[21].mxu0 }
 0xdc3   :  { %v1849_v42 = vadd.f32 %v3885_v15, %v1848_v40 }
 0xdc4   :  { %v1858_v21 = vmax.f32 %v1854_v39, 0.0 }
 0xdc5   :  { %v1857_v44 = vmax.f32 %v1849_v42, 0.0 }
 0xdc7   :  { %4181 = vmatprep.mubr.msk.f32.mxu1 %vm222_vm2, %v1857_v44 }
 0xdc8   :  { %4182 = vmatmul.mubr.msk.f32.vlgmr.msra.gmra.mrb[18].mxu1 %vm222_vm2, %v1858_v21 }
 0xdc9   :  { %4197 = vmatprep.mubr.msk.f32.mxu1 %vm4636_vm3, %v4635_v17 }
 0xe9b   :  { %v4183_v47 = vpop.f32.mrb[18].mxu1 }
 0xe9c   :  { %v1948_v48 = vadd.f32 %v4183_v47, %v3888_v46  ;;  %v1942_v49 = vpop.f32.mrb[19].mxu1 }
 0xe9d   :  { %v1943_v50 = vadd.f32 %v3888_v46, %v1942_v49 }
 0xe9e   :  { %v5031_v52 = vadd.f32 %v1948_v48, %v1764_v32 }
 0xe9f   :  { %v5029_v51 = vadd.f32 %v1943_v50, %v1763_v31 }
 0xea1   :  { %4192 = vmatprep.mubr.msk.f32.mxu0 %vm222_vm2, %v5029_v51 }
 0xea2   :  { %4193 = vmatmul.mubr.msk.f32.vlgmr.msra.gmra.mrb[22].mxu0 %vm222_vm2, %v5031_v52 }
 0xea3   :  { %4202 = vmatprep.mubr.msk.f32.mxu0 %vm4636_vm3, %v4635_v17 }
 0xf75   :  { %v4194_v54 = vpop.f32.mrb[22].mxu0 }
 0xf76   :  { %v5042_v55 = vadd.f32 %v4194_v54, %v3892_v53  ;;  %v2038_v22 = vpop.f32.mrb[23].mxu0 }
 0xf77   :  { %v5044_v56 = vadd.f32 %v3892_v53, %v2038_v22 }
 0xf78   :  { %2125 = vrot.lane.b32.xlu1 %v5042_v55, %s4637_s29 }
 0xf79   :  { %2048 = vrot.lane.b32.xlu0 %v5044_v56, %s4637_s29 }
 0xfea   :  { %v2126_v57 = vpop.permute.xlu1 %2125 }
 0xfeb   :  { %4201 = vmatpush3.xpose.msk.msra.mxu0 %vm307_vm4, %v2126_v57  ;;  %v2049_v58 = vpop.permute.xlu0 %2048 }
 0xfec   :  { %4196 = vmatpush3.xpose.msk.msra.mxu1 %vm307_vm4, %v2049_v58  ;;  %4210 = vmatprep.subr.mxu0 %v4635_v17 }
 0xfed   :  { %4205 = vmatprep.subr.mxu1 %v4635_v17 }
 0xfee   :  { %4203 = vmatmul.mubr.msk.f32.vlgmr.msra.gmra.mrb[24].mxu0 %vm307_vm4, %v5042_v55 }
 0xfef   :  { %4198 = vmatmul.mubr.msk.f32.vlgmr.msra.gmra.mrb[20].mxu1 %vm307_vm4, %v5044_v56  ;;  %4212 = vmatprep.mubr.msk.f32.mxu0 %vm4636_vm3, %v4635_v17 }
 0xff0   :  { %4207 = vmatprep.mubr.msk.f32.mxu1 %vm4636_vm3, %v4635_v17 }
0x10c1   :  { %v2197_v59 = vpop.f32.mrb[24].mxu0 }
0x10c2   :  { %v2202_v60 = vmul.f32 0.35355338, %v2197_v59  ;;  %v2120_v61 = vpop.f32.mrb[20].mxu1  ;;  %v4204_v63 = vpop.f32.mrb[25].mxu0 }
0x10c3   :  { %v2201_v1 = vmul.f32 0.35355338, %v2120_v61  ;;  %v4199_v2 = vpop.f32.mrb[21].mxu1 }
0x10c4   :  { %v2204_v3 = vadd.f32 %v2202_v60, %v4862_v30 }
0x10c5   :  { %v2203_v4 = vadd.f32 %v2201_v1, %v4862_v30 }
0x10c6   :  { %v2208_v5 = vsel %vm307_vm4, %v2204_v3, -inf }
0x10c7   :  { %2209 = vmax.xlane.f32.xlu1 %v2208_v5  ;;  %v2205_v6 = vsel %vm307_vm4, %v2203_v4, -inf }
0x10c8   :  { %2206 = vmax.xlane.f32.xlu0 %v2205_v6 }
0x10d8   :  { %2227 = vrot.lane.b32.xlu1 %v5044_v56, %s4639_s18 }
0x10dc   :  { %2381 = vrot.lane.b32.xlu1 %v5044_v56, %s4640_s22 }
0x10de   :  { %2303 = vrot.lane.b32.xlu0 %v5042_v55, %s4639_s18 }
0x10e0   :  { %2459 = vrot.lane.b32.xlu1 %v5042_v55, %s4640_s22 }
0x10e4   :  { %2457 = vrot.lane.b32.xlu1 %v5042_v55, %s4641_s23 }
0x1154   :  { %v2210_v7 = vpop.xlane.xlu1 %2209 }
0x1155   :  { %v2212_v8 = vsub.f32 %v2204_v3, %v2210_v7  ;;  %v2207_v9 = vpop.xlane.xlu0 %2206 }
0x1156   :  { %v2211_v10 = vsub.f32 %v2203_v4, %v2207_v9 }
0x1157   :  { %v2215_v11 = vmul.f32 1.442695, %v2212_v8 }
0x1158   :  { %v2213_v12 = vmul.f32 1.442695, %v2211_v10  ;;  %v2228_v13 = vpop.permute.xlu1 %2227 }
0x1159   :  { %4447 = vpow2.f32 %v2215_v11  ;;  %4206 = vmatpush3.msra.mxu1 %v2228_v13  ;;  %v2304_v14 = vpop.permute.xlu0 %2303 }
0x115a   :  { %4211 = vmatpush3.msra.mxu0 %v2304_v14  ;;  %4215 = vmatprep.subr.mxu1 %v4635_v17  ;;  %4449 = vpow2.f32 %v2213_v12 }
0x115b   :  { %4220 = vmatprep.subr.mxu0 %v4635_v17 }
0x115c   :  { %v2382_v0 = vpop.permute.xlu1 %2381 }
0x1160   :  { %v2460_v26 = vpop.permute.xlu1 %2459 }
0x1163   :  { %v4448_v62 = vpop.eup %4447 }
0x1164   :  { %v2220_v18 = vsel %vm307_vm4, %v4448_v62, 0.0  ;;  %v4450_v19 = vpop.eup %4449  ;;  %v2458_v32 = vpop.permute.xlu1 %2457 }
0x1165   :  { %2221 = vadd.xlane.f32.xlu0 %v2220_v18  ;;  %v2217_v20 = vsel %vm307_vm4, %v4450_v19, 0.0 }
0x1169   :  { %2218 = vadd.xlane.f32.xlu0 %v2217_v20 }
0x117f   :  { %2379 = vrot.lane.b32.xlu0 %v5044_v56, %s4641_s23 }
0x11f2   :  { %v2222_v23 = vpop.xlane.xlu0 %2221 }
0x11f3   :  { %4451 = vrcp.f32 %v2222_v23 }
0x11f6   :  { %v2219_v24 = vpop.xlane.xlu0 %2218 }
0x11f7   :  { %4453 = vrcp.f32 %v2219_v24 }
0x11fa   :  { %v2380_v33 = vpop.permute.xlu0 %2379 }
0x11fd   :  { %v4452_v25 = vpop.eup %4451 }
0x11fe   :  { %v2226_v28 = vmul.f32 %v4452_v25, %v4448_v62 }
0x1200   :  { %4213 = vmatmul.mubr.msk.f32.vlgmr.msra.gmra.mrb[26].mxu0 %vm307_vm4, %v2226_v28 }
0x1201   :  { %v4454_v29 = vpop.eup %4453  ;;  %4221 = vmatpush3.xpose.msk.msra.mxu0 %vm307_vm4, %v2460_v26  ;;  %4222 = vmatprep.mubr.msk.f32.mxu0 %vm4636_vm3, %v4635_v17 }
0x1202   :  { %v2224_v31 = vmul.f32 %v4454_v29, %v4450_v19  ;;  %4230 = vmatprep.subr.mxu0 %v4635_v17 }
0x1204   :  { %4208 = vmatmul.mubr.msk.f32.vlgmr.msra.gmra.mrb[22].mxu1 %vm307_vm4, %v2224_v31  ;;  %4223 = vmatmul.mubr.msk.f32.vlgmr.msra.gmra.mrb[28].mxu0 %vm307_vm4, %v2458_v32 }
0x1205   :  { %4216 = vmatpush3.xpose.msk.msra.mxu1 %vm307_vm4, %v2382_v0  ;;  %4217 = vmatprep.mubr.msk.f32.mxu1 %vm4636_vm3, %v4635_v17 }
0x1206   :  { %4225 = vmatprep.subr.mxu1 %v4635_v17  ;;  %4232 = vmatprep.mubr.msk.f32.mxu0 %vm4636_vm3, %v4635_v17 }
0x1208   :  { %4218 = vmatmul.mubr.msk.f32.vlgmr.msra.gmra.mrb[24].mxu1 %vm307_vm4, %v2380_v33 }
0x1209   :  { %4227 = vmatprep.mubr.msk.f32.mxu1 %vm4636_vm3, %v4635_v17 }
0x12d3   :  { %v5098_v34 = vpop.f32.mrb[26].mxu0 }
0x12d4   :  { %v4214_v35 = vpop.f32.mrb[27].mxu0 }
0x12d7   :  { %v5100_v36 = vpop.f32.mrb[22].mxu1  ;;  %v2531_v37 = vpop.f32.mrb[28].mxu0 }
0x12d8   :  { %v2536_v38 = vmul.f32 0.35355338, %v2531_v37  ;;  %v4209_v15 = vpop.f32.mrb[23].mxu1  ;;  %v4224_v16 = vpop.f32.mrb[29].mxu0 }
0x12da   :  { %v2538_v39 = vadd.f32 %v2536_v38, %v4862_v30 }
0x12db   :  { %v2453_v40 = vpop.f32.mrb[24].mxu1 }
0x12dc   :  { %v2535_v42 = vmul.f32 0.35355338, %v2453_v40  ;;  %v4219_v44 = vpop.f32.mrb[25].mxu1  ;;  %v2542_v21 = vsel %vm307_vm4, %v2538_v39, -inf }
0x12dd   :  { %2543 = vmax.xlane.f32.xlu1 %v2542_v21 }
0x12de   :  { %v2537_v45 = vadd.f32 %v2535_v42, %v4862_v30 }
0x12e0   :  { %v2539_v41 = vsel %vm307_vm4, %v2537_v45, -inf }
0x12e1   :  { %2540 = vmax.xlane.f32.xlu0 %v2539_v41 }
0x12ee   :  { %2561 = vrot.lane.b32.xlu1 %v5044_v56, %s4642_s24 }
0x12f2   :  { %2715 = vrot.lane.b32.xlu1 %v5044_v56, %s4643_s25 }
0x12f6   :  { %2793 = vrot.lane.b32.xlu1 %v5042_v55, %s4643_s25 }
0x12f7   :  { %2637 = vrot.lane.b32.xlu0 %v5042_v55, %s4642_s24 }
0x12fa   :  { %2791 = vrot.lane.b32.xlu1 %v5042_v55, %s4644_s26 }
0x136a   :  { %v2544_v43 = vpop.xlane.xlu1 %2543 }
0x136b   :  { %v2546_v46 = vsub.f32 %v2538_v39, %v2544_v43 }
0x136d   :  { %v2549_v47 = vmul.f32 1.442695, %v2546_v46 }
0x136e   :  { %v2562_v48 = vpop.permute.xlu1 %2561  ;;  %v2541_v49 = vpop.xlane.xlu0 %2540 }
0x136f   :  { %4455 = vpow2.f32 %v2549_v47  ;;  %v2545_v50 = vsub.f32 %v2537_v45, %v2541_v49  ;;  %4226 = vmatpush3.msra.mxu1 %v2562_v48 }
0x1370   :  { %4235 = vmatprep.subr.mxu1 %v4635_v17 }
0x1371   :  { %v2547_v53 = vmul.f32 1.442695, %v2545_v50 }
0x1372   :  { %v2638_v54 = vpop.permute.xlu0 %2637  ;;  %v2716_v63 = vpop.permute.xlu1 %2715 }
0x1373   :  { %4457 = vpow2.f32 %v2547_v53  ;;  %4231 = vmatpush3.msra.mxu0 %v2638_v54 }
0x1374   :  { %4240 = vmatprep.subr.mxu0 %v4635_v17 }
0x1376   :  { %v2794_v2 = vpop.permute.xlu1 %2793 }
0x1379   :  { %v4456_v22 = vpop.eup %4455 }
0x137a   :  { %v2554_v57 = vsel %vm307_vm4, %v4456_v22, 0.0  ;;  %v2792_v6 = vpop.permute.xlu1 %2791 }
0x137b   :  { %2555 = vadd.xlane.f32.xlu0 %v2554_v57 }
0x137d   :  { %v4458_v58 = vpop.eup %4457 }
0x137e   :  { %v2551_v59 = vsel %vm307_vm4, %v4458_v58, 0.0 }
0x137f   :  { %2552 = vadd.xlane.f32.xlu0 %v2551_v59 }
0x1395   :  { %2713 = vrot.lane.b32.xlu0 %v5044_v56, %s4644_s26 }
0x1408   :  { %v2556_v60 = vpop.xlane.xlu0 %2555 }
0x1409   :  { %4459 = vrcp.f32 %v2556_v60 }
0x140c   :  { %v2553_v61 = vpop.xlane.xlu0 %2552 }
0x140d   :  { %4461 = vrcp.f32 %v2553_v61 }
0x1410   :  { %v2714_v7 = vpop.permute.xlu0 %2713 }
0x1413   :  { %v4460_v1 = vpop.eup %4459 }
0x1414   :  { %v2560_v3 = vmul.f32 %v4460_v1, %v4456_v22 }
0x1416   :  { %4233 = vmatmul.mubr.msk.f32.vlgmr.msra.gmra.mrb[30].mxu0 %vm307_vm4, %v2560_v3 }
0x1417   :  { %v4462_v4 = vpop.eup %4461  ;;  %4241 = vmatpush3.xpose.msk.msra.mxu0 %vm307_vm4, %v2794_v2  ;;  %4242 = vmatprep.mubr.msk.f32.mxu0 %vm4636_vm3, %v4635_v17 }
0x1418   :  { %v2558_v5 = vmul.f32 %v4462_v4, %v4458_v58  ;;  %4250 = vmatprep.subr.mxu0 %v4635_v17 }
0x141a   :  { %4228 = vmatmul.mubr.msk.f32.vlgmr.msra.gmra.mrb[26].mxu1 %vm307_vm4, %v2558_v5  ;;  %4243 = vmatmul.mubr.msk.f32.vlgmr.msra.gmra.mrb[32].mxu0 %vm307_vm4, %v2792_v6 }
0x141b   :  { %4236 = vmatpush3.xpose.msk.msra.mxu1 %vm307_vm4, %v2716_v63  ;;  %4237 = vmatprep.mubr.msk.f32.mxu1 %vm4636_vm3, %v4635_v17 }
0x141c   :  { %4245 = vmatprep.subr.mxu1 %v4635_v17  ;;  %4252 = vmatprep.mubr.msk.f32.mxu0 %vm4636_vm3, %v4635_v17 }
0x141e   :  { %4238 = vmatmul.mubr.msk.f32.vlgmr.msra.gmra.mrb[28].mxu1 %vm307_vm4, %v2714_v7 }
0x141f   :  { %4247 = vmatprep.mubr.msk.f32.mxu1 %vm4636_vm3, %v4635_v17 }
0x14e9   :  { %v5138_v8 = vpop.f32.mrb[30].mxu0 }
0x14ea   :  { %v4234_v9 = vpop.f32.mrb[31].mxu0 }
0x14ed   :  { %v5140_v10 = vpop.f32.mrb[26].mxu1  ;;  %v2865_v11 = vpop.f32.mrb[32].mxu0 }
0x14ee   :  { %v2870_v12 = vmul.f32 0.35355338, %v2865_v11  ;;  %v4229_v13 = vpop.f32.mrb[27].mxu1  ;;  %v4244_v14 = vpop.f32.mrb[33].mxu0 }
0x14f0   :  { %v2872_v62 = vadd.f32 %v2870_v12, %v4862_v30 }
0x14f1   :  { %v2787_v18 = vpop.f32.mrb[28].mxu1 }
0x14f2   :  { %v2869_v19 = vmul.f32 0.35355338, %v2787_v18  ;;  %v4239_v20 = vpop.f32.mrb[29].mxu1  ;;  %v2876_v23 = vsel %vm307_vm4, %v2872_v62, -inf }
0x14f3   :  { %2877 = vmax.xlane.f32.xlu1 %v2876_v23  ;;  %v3412_v20 = vld [vmem:[#allocation5 + $0x20] sm:$0xff]  ;;  %v3413_v23 = vld [vmem:[#allocation5 + $0x28] sm:$0xff] }
0x14f4   :  { %v2871_v24 = vadd.f32 %v2869_v19, %v4862_v30 }
0x14f6   :  { %v2873_v0 = vsel %vm307_vm4, %v2871_v24, -inf }
0x14f7   :  { %2874 = vmax.xlane.f32.xlu0 %v2873_v0  ;;  %v3415_v0 = vld [vmem:[#allocation5 + $0x38] sm:$0xff] }
0x1504   :  { %2895 = vrot.lane.b32.xlu1 %v5044_v56, %s4645_s8 }
0x1508   :  { %3049 = vrot.lane.b32.xlu1 %v5044_v56, %s4646_s17 }
0x150c   :  { %3127 = vrot.lane.b32.xlu1 %v5042_v55, %s4646_s17 }
0x150d   :  { %2971 = vrot.lane.b32.xlu0 %v5042_v55, %s4645_s8 }
0x1510   :  { %3125 = vrot.lane.b32.xlu1 %v5042_v55, %s4647_s27 }
0x1580   :  { %v2878_v25 = vpop.xlane.xlu1 %2877 }
0x1581   :  { %v2880_v26 = vsub.f32 %v2872_v62, %v2878_v25 }
0x1583   :  { %v2883_v28 = vmul.f32 1.442695, %v2880_v26  ;;  %v3508_v26 = vld [vmem:[#allocation7 + $0x20] sm:$0xff] }
0x1584   :  { %v2896_v29 = vpop.permute.xlu1 %2895  ;;  %v2875_v31 = vpop.xlane.xlu0 %2874 }
0x1585   :  { %4463 = vpow2.f32 %v2883_v28  ;;  %v2879_v32 = vsub.f32 %v2871_v24, %v2875_v31  ;;  %4246 = vmatpush3.msra.mxu1 %v2896_v29  ;;  %v4359_v24 = vpack.c.bf16 %v3413_v23, %v3412_v20  ;;  %v3509_v28 = vld [vmem:[#allocation7 + $0x28] sm:$0xff] }
0x1586   :  { %4255 = vmatprep.subr.mxu1 %v4635_v17  ;;  %v4367_v29 = vpack.c.bf16 %v3509_v28, %v3508_v26 }
0x1587   :  { %v2881_v33 = vmul.f32 1.442695, %v2879_v32 }
0x1588   :  { %v2972_v35 = vpop.permute.xlu0 %2971  ;;  %v3050_v42 = vpop.permute.xlu1 %3049 }
0x1589   :  { %4465 = vpow2.f32 %v2881_v33  ;;  %4251 = vmatpush3.msra.mxu0 %v2972_v35 }
0x158a   :  { %4260 = vmatprep.subr.mxu0 %v4635_v17 }
0x158c   :  { %v3128_v21 = vpop.permute.xlu1 %3127 }
0x158f   :  { %v4464_v37 = vpop.eup %4463 }
0x1590   :  { %v2888_v38 = vsel %vm307_vm4, %v4464_v37, 0.0  ;;  %v3126_v46 = vpop.permute.xlu1 %3125 }
0x1591   :  { %2889 = vadd.xlane.f32.xlu0 %v2888_v38 }
0x1593   :  { %v4466_v15 = vpop.eup %4465 }
0x1594   :  { %v2885_v16 = vsel %vm307_vm4, %v4466_v15, 0.0 }
0x1595   :  { %2886 = vadd.xlane.f32.xlu0 %v2885_v16 }
0x15ab   :  { %3047 = vrot.lane.b32.xlu0 %v5044_v56, %s4647_s27 }
0x161e   :  { %v2890_v39 = vpop.xlane.xlu0 %2889 }
0x161f   :  { %4467 = vrcp.f32 %v2890_v39 }
0x1622   :  { %v2887_v40 = vpop.xlane.xlu0 %2886 }
0x1623   :  { %4469 = vrcp.f32 %v2887_v40 }
0x1626   :  { %v3048_v47 = vpop.permute.xlu0 %3047 }
0x1629   :  { %v4468_v44 = vpop.eup %4467 }
0x162a   :  { %v2894_v45 = vmul.f32 %v4468_v44, %v4464_v37 }
0x162c   :  { %4253 = vmatmul.mubr.msk.f32.vlgmr.msra.gmra.mrb[34].mxu0 %vm307_vm4, %v2894_v45 }
0x162d   :  { %v4470_v41 = vpop.eup %4469  ;;  %4261 = vmatpush3.xpose.msk.msra.mxu0 %vm307_vm4, %v3128_v21  ;;  %4262 = vmatprep.mubr.msk.f32.mxu0 %vm4636_vm3, %v4635_v17 }
0x162e   :  { %v2892_v43 = vmul.f32 %v4470_v41, %v4466_v15  ;;  %4270 = vmatprep.subr.mxu0 %v4635_v17 }
0x1630   :  { %4248 = vmatmul.mubr.msk.f32.vlgmr.msra.gmra.mrb[30].mxu1 %vm307_vm4, %v2892_v43  ;;  %4263 = vmatmul.mubr.msk.f32.vlgmr.msra.gmra.mrb[36].mxu0 %vm307_vm4, %v3126_v46  ;;  %v3510_v46 = vld [vmem:[#allocation7 + $0x30] sm:$0xff] }
0x1631   :  { %4256 = vmatpush3.xpose.msk.msra.mxu1 %vm307_vm4, %v3050_v42  ;;  %4257 = vmatprep.mubr.msk.f32.mxu1 %vm4636_vm3, %v4635_v17 }
0x1632   :  { %4265 = vmatprep.subr.mxu1 %v4635_v17  ;;  %4272 = vmatprep.mubr.msk.f32.mxu0 %vm4636_vm3, %v4635_v17 }
0x1634   :  { %4258 = vmatmul.mubr.msk.f32.vlgmr.msra.gmra.mrb[32].mxu1 %vm307_vm4, %v3048_v47  ;;  %v3511_v47 = vld [vmem:[#allocation7 + $0x38] sm:$0xff] }
0x1635   :  { %4267 = vmatprep.mubr.msk.f32.mxu1 %vm4636_vm3, %v4635_v17 }
0x16ff   :  { %v3043_v48 = vpop.f32.mrb[34].mxu0 }
0x1700   :  { %v4254_v49 = vpop.f32.mrb[35].mxu0 }
0x1703   :  { %v2967_v50 = vpop.f32.mrb[30].mxu1  ;;  %v3199_v53 = vpop.f32.mrb[36].mxu0 }
0x1704   :  { %v3204_v54 = vmul.f32 0.35355338, %v3199_v53  ;;  %v4249_v22 = vpop.f32.mrb[31].mxu1  ;;  %v4264_v57 = vpop.f32.mrb[37].mxu0 }
0x1706   :  { %v3206_v58 = vadd.f32 %v3204_v54, %v4862_v30 }
0x1707   :  { %v3121_v59 = vpop.f32.mrb[32].mxu1 }
0x1708   :  { %v3203_v60 = vmul.f32 0.35355338, %v3121_v59  ;;  %v4259_v61 = vpop.f32.mrb[33].mxu1  ;;  %v3210_v63 = vsel %vm307_vm4, %v3206_v58, -inf }
0x1709   :  { %3211 = vmax.xlane.f32.xlu1 %v3210_v63  ;;  %v3607_v61 = vld [vmem:[#allocation8 + $0x38] sm:$0xff] }
0x170a   :  { %v3205_v1 = vadd.f32 %v3203_v60, %v4862_v30  ;;  %v3606_v60 = vld [vmem:[#allocation8 + $0x30] sm:$0xff] }
0x170b   :  { %v4379_v63 = vpack.c.bf16 %v3607_v61, %v3606_v60 }
0x170c   :  { %v3207_v2 = vsel %vm307_vm4, %v3205_v1, -inf }
0x170d   :  { %3208 = vmax.xlane.f32.xlu0 %v3207_v2  ;;  %v3700_v2 = vld [vmem:[%s5283_s12 + $0x8] sm:$0xff] }
0x171a   :  { %3229 = vrot.lane.b32.xlu1 %v5044_v56, %s4648_s28 }
0x171e   :  { %3383 = vrot.lane.b32.xlu1 %v5140_v10, %s4632_s16 }
0x1722   :  { %3385 = vrot.lane.b32.xlu1 %v5138_v8, %s4632_s16 }
0x1726   :  { %3393 = vrot.lane.b32.xlu1 %v3043_v48, %s4649_s4  ;;  %v3604_v48 = vld [vmem:[#allocation8 + $0x20] sm:$0xff] }
0x1796   :  { %v3212_v17 = vpop.xlane.xlu1 %3211 }
0x1797   :  { %v3214_v3 = vsub.f32 %v3206_v58, %v3212_v17 }
0x1799   :  { %v3217_v4 = vmul.f32 1.442695, %v3214_v3 }
0x179a   :  { %v3230_v5 = vpop.permute.xlu1 %3229  ;;  %v3209_v6 = vpop.xlane.xlu0 %3208 }
0x179b   :  { %4471 = vpow2.f32 %v3217_v4  ;;  %v3213_v30 = vsub.f32 %v3205_v1, %v3209_v6  ;;  %4266 = vmatpush3.msra.mxu1 %v3230_v5  ;;  %v3699_v1 = vld [vmem:[%s5283_s12] sm:$0xff] }
0x179c   :  { %4360 = vmatprep.subr.bf16.mxu1 %v4359_v24 }
0x179d   :  { %v3215_v7 = vmul.f32 1.442695, %v3213_v30 }
0x179e   :  { %v3384_v37 = vpop.permute.xlu1 %3383 }
0x179f   :  { %4473 = vpow2.f32 %v3215_v7  ;;  %v3405_v39 = vsel %vm307_vm4, %v5100_v36, %v3384_v37  ;;  %v4371_v36 = vpack.c.bf16 %v3511_v47, %v3510_v46  ;;  %v3701_v7 = vld [vmem:[%s5283_s12 + $0x10] sm:$0xff] }
0x17a2   :  { %v3386_v38 = vpop.permute.xlu1 %3385 }
0x17a3   :  { %v3406_v42 = vsel %vm307_vm4, %v5098_v34, %v3386_v38  ;;  %v3605_v34 = vld [vmem:[#allocation8 + $0x28] sm:$0xff] }
0x17a4   :  { %v4375_v49 = vpack.c.bf16 %v3605_v34, %v3604_v48 }
0x17a5   :  { %v4472_v9 = vpop.eup %4471 }
0x17a6   :  { %v3222_v56 = vsel %vm307_vm4, %v4472_v9, 0.0  ;;  %v3394_v15 = vpop.permute.xlu1 %3393 }
0x17a7   :  { %3223 = vadd.xlane.f32.xlu0 %v3222_v56  ;;  %v3408_v45 = vsel %vm1665_vm7, %v3406_v42, %v3394_v15 }
0x17a9   :  { %v4474_v10 = vpop.eup %4473 }
0x17aa   :  { %v3219_v11 = vsel %vm307_vm4, %v4474_v10, 0.0 }
0x17ab   :  { %3220 = vadd.xlane.f32.xlu0 %v3219_v11 }
0x17c1   :  { %3305 = vrot.lane.b32.xlu0 %v5042_v55, %s4648_s28  ;;  %v3414_v55 = vld [vmem:[#allocation5 + $0x30] sm:$0xff] }
0x17c2   :  { %v4363_v25 = vpack.c.bf16 %v3415_v0, %v3414_v55 }
0x17c5   :  { %3391 = vrot.lane.b32.xlu0 %v2967_v50, %s4649_s4  ;;  %v3920_v50 = vld [vmem:[%s5278_s7 + $0x1] ss:$0 sm:$0xff] }
0x1834   :  { %v3224_v8 = vpop.xlane.xlu0 %3223 }
0x1835   :  { %4475 = vrcp.f32 %v3224_v8 }
0x1838   :  { %v3221_v12 = vpop.xlane.xlu0 %3220 }
0x1839   :  { %4477 = vrcp.f32 %v3221_v12 }
0x183c   :  { %v3306_v13 = vpop.permute.xlu0 %3305 }
0x183d   :  { %4271 = vmatpush3.msra.mxu0 %v3306_v13 }
0x183e   :  { %4368 = vmatprep.subr.bf16.mxu0 %v4367_v29 }
0x183f   :  { %v4476_v14 = vpop.eup %4475 }
0x1840   :  { %v3228_v62 = vmul.f32 %v4476_v14, %v4472_v9  ;;  %v3392_v16 = vpop.permute.xlu0 %3391  ;;  %v3702_v9 = vld [vmem:[%s5283_s12 + $0x18] sm:$0xff] }
0x1841   :  { %v3407_v44 = vsel %vm1665_vm7, %v3405_v39, %v3392_v16  ;;  %v4387_v56 = vpack.c.bf16 %v3702_v9, %v3701_v7 }
0x1842   :  { %4273 = vmatmul.mubr.msk.f32.vlgmr.msra.gmra.mrb[38].mxu0 %vm307_vm4, %v3228_v62 }
0x1843   :  { %v4478_v18 = vpop.eup %4477  ;;  %4370 = vmatpush3.bf16.msra.mxu0 %v4367_v29 }
0x1844   :  { %v3226_v19 = vmul.f32 %v4478_v18, %v4474_v10  ;;  %4372 = vmatprep.subr.bf16.mxu0 %v4371_v36  ;;  %v3928_v10 = vld [vmem:[%s5282_s11 + $0x1] ss:$0 sm:$0xff]  ;;  %v3931_v18 = vld [vmem:[%s5284_s13] ss:$0 sm:$0xff]  ;;  %s4651_s11 = smov [#allocation11]  }
0x1845   :  { %s3833_s12 = sshll.u32 %s4651_s11, 4  ;;  %s3834_s12 = int_to_ptr.vmem [resolvable:$true] %s3833_s12 }
0x1846   :  { %4268 = vmatmul.mubr.msk.f32.vlgmr.msra.gmra.mrb[34].mxu1 %vm307_vm4, %v3226_v19  ;;  %s4575_s13 = scalar_lea.vmem %s3834_s12, 256  ;;  %p4580_p5 = scmp.lt.s32.totalorder %s3834_s12, %s3834_s12 }
0x1847   :  { %4362 = vmatpush3.bf16.msra.mxu1 %v4359_v24  ;;  %4374 = vmatpush3.bf16.msra.mxu0 %v4371_v36  ;;  %p4576_p4 = scmp.ne.s32.totalorder %s3834_s12, %s4575_s13  ;;  %p4581_p6 = scmp.lt.s32.totalorder %s4575_s13, %s4575_s13 }
0x1848   :  { %4364 = vmatprep.subr.bf16.mxu1 %v4363_v25 }
0x1849   :  { %p4582_p7 = por %p4581_p6, %p4580_p5 }
0x184b   :  { %4366 = vmatpush3.bf16.msra.mxu1 %v4363_v25  ;;  %p4583_p8 = pnand %p4582_p7, %p4576_p4 }
0x184c   :  { %4376 = vmatprep.subr.bf16.mxu1 %v4375_v49 }
0x1915   :  { %v3377_v31 = vpop.f32.mrb[38].mxu0 }
0x1916   :  { %3401 = vrot.lane.b32.xlu1 %v3377_v31, %s4650_s21  ;;  %v4274_v32 = vpop.f32.mrb[39].mxu0 }
0x1919   :  { %v3301_v33 = vpop.f32.mrb[34].mxu1 }
0x191a   :  { %3399 = vrot.lane.b32.xlu0 %v3301_v33, %s4650_s21  ;;  %v4269_v35 = vpop.f32.mrb[35].mxu1 }
0x1988   :  { %v3402_v40 = vpop.permute.xlu1 %3401 }
0x1989   :  { %v3410_v43 = vsel %vm1668_vm6, %v3408_v45, %v3402_v40 }
0x198c   :  { %v3400_v21 = vpop.permute.xlu0 %3399 }
0x198d   :  { %v3409_v41 = vsel %vm1668_vm6, %v3407_v44, %v3400_v21 }
0x198e   :  { %4283 = vmatprep.mubr.msk.f32.mxu1 %vm222_vm2, %v3409_v41 }
0x198f   :  { %4284 = vmatmul.mubr.msk.f32.vlgmr.msra.gmra.mrb[36].mxu1 %vm222_vm2, %v3410_v43 }
0x1990   :  { %4378 = vmatpush3.bf16.msra.mxu1 %v4375_v49 }
0x1991   :  { %4380 = vmatprep.subr.bf16.mxu1 %v4379_v63 }
0x1994   :  { %4382 = vmatpush3.bf16.msra.mxu1 %v4379_v63 }
0x1a62   :  { %v4285_v53 = vpop.f32.mrb[36].mxu1 }
0x1a63   :  { %v3502_v54 = vadd.f32 %v4285_v53, %v3920_v50  ;;  %v3496_v22 = vpop.f32.mrb[37].mxu1 }
0x1a64   :  { %v3497_v57 = vadd.f32 %v3920_v50, %v3496_v22 }
0x1a65   :  { %v3506_v59 = vadd.f32 %v3502_v54, %v5031_v52  ;;  %v3924_v52 = vld [vmem:[%s5280_s9 + $0x1] ss:$0 sm:$0xff] }
0x1a66   :  { %v3505_v58 = vadd.f32 %v3497_v57, %v5029_v51  ;;  %v4383_v51 = vpack.c.bf16 %v3700_v2, %v3699_v1 }
0x1a68   :  { %4294 = vmatprep.mubr.msk.f32.mxu0 %vm222_vm2, %v3505_v58  ;;  %4384 = vmatprep.subr.bf16.mxu0 %v4383_v51 }
0x1a69   :  { %4295 = vmatmul.mubr.msk.f32.vlgmr.msra.gmra.mrb[40].mxu0 %vm222_vm2, %v3506_v59 }
0x1a6a   :  { %4386 = vmatpush3.bf16.msra.mxu0 %v4383_v51 }
0x1a6b   :  { %4388 = vmatprep.subr.bf16.mxu0 %v4387_v56 }
0x1a6e   :  { %4390 = vmatpush3.bf16.msra.mxu0 %v4387_v56 }
0x1b3c   :  { %v4296_v17 = vpop.f32.mrb[40].mxu0 }
0x1b3d   :  { %v3598_v3 = vadd.f32 %v4296_v17, %v3924_v52  ;;  %v3592_v4 = vpop.f32.mrb[41].mxu0 }
0x1b3e   :  { %v3593_v5 = vadd.f32 %v3924_v52, %v3592_v4 }
0x1b3f   :  { %v3602_v30 = vmax.f32 %v3598_v3, 0.0 }
0x1b40   :  { %v3601_v6 = vmax.f32 %v3593_v5, 0.0 }
0x1b42   :  { %4305 = vmatprep.mubr.msk.f32.mxu1 %vm222_vm2, %v3601_v6 }
0x1b43   :  { %4306 = vmatmul.mubr.msk.f32.vlgmr.msra.gmra.mrb[38].mxu1 %vm222_vm2, %v3602_v30 }
0x1c16   :  { %v4307_v11 = vpop.f32.mrb[38].mxu1 }
0x1c17   :  { %v3694_v8 = vadd.f32 %v4307_v11, %v3928_v10  ;;  %v3688_v12 = vpop.f32.mrb[39].mxu1 }
0x1c18   :  { %v3689_v13 = vadd.f32 %v3928_v10, %v3688_v12 }
0x1c19   :  { %v3698_v62 = vadd.f32 %v3694_v8, %v3506_v59 }
0x1c1a   :  { %v3697_v14 = vadd.f32 %v3689_v13, %v3505_v58 }
0x1c1c   :  { %4316 = vmatprep.mubr.msk.f32.mxu0 %vm222_vm2, %v3697_v14 }
0x1c1d   :  { %4317 = vmatmul.mubr.msk.f32.vlgmr.msra.gmra.mrb[42].mxu0 %vm222_vm2, %v3698_v62 }
0x1cf0   :  { %v4318_v19 = vpop.f32.mrb[42].mxu0 }
0x1cf1   :  { %v3788_v20 = vadd.f32 %v4318_v19, %v3931_v18  ;;  %v3782_v23 = vpop.f32.mrb[43].mxu0 }
0x1cf2   :  { %v3783_v24 = vadd.f32 %v3931_v18, %v3782_v23 }
0x1cf3   :  { %3792 = vst [vmem:[#allocation11 + $0x8] sm:$0xff] %v3788_v20  ;;  %v3795_v55 = vsel %vm3793_vm8, %v3788_v20, -1e+30 }
0x1cf4   :  { %3791 = vst [vmem:[#allocation11] sm:$0xff] %v3783_v24  ;;  %3798 = vmax.xlane.f32.xlu1 %v3795_v55  ;;  %v3794_v0 = vsel %vm3793_vm8, %v3783_v24, -1e+30 }
0x1cf5   :  { %3796 = vmax.xlane.f32.xlu0 %v3794_v0 }
0x1d81   :  { %v3799_v25 = vpop.xlane.xlu1 %3798 }
0x1d82   :  { %v3797_v26 = vpop.xlane.xlu0 %3796  ;;  %v3801_v28 = vsub.f32 %v3795_v55, %v3799_v25 }
0x1d83   :  { %v3800_v29 = vsub.f32 %v3794_v0, %v3797_v26 }
0x1d84   :  { %v3804_v32 = vmul.f32 1.442695, %v3801_v28 }
0x1d85   :  { %v3802_v31 = vmul.f32 1.442695, %v3800_v29 }
0x1d87   :  { %4479 = vpow2.f32 %v3802_v31 }
0x1d88   :  { %4481 = vpow2.f32 %v3804_v32 }
0x1d91   :  { %v4480_v33 = vpop.eup %4479 }
0x1d92   :  { %3806 = vadd.xlane.f32.xlu0 %v4480_v33  ;;  %v4482_v27 = vpop.eup %4481 }
0x1d96   :  { %3808 = vadd.xlane.f32.xlu0 %v4482_v27 }
0x1d97   :  { %4586 = shalt.err (!%p4583_p8)
}
0x1d98   :  { %s4587_s1 = scalar_lea.hbm %s5286_s15, 256 }
0x1d99   :  { %p4588_p9 = scmp.ne.s32.totalorder %s5286_s15, %s4587_s1  ;;  %p4591_p10 = scmp.lt.u32.totalorder %s4587_s1, %s5286_s15 }
0x1d9b   :  { %p4593_p11 = pnand %p4591_p10, %p4588_p9 }
0x1d9d   :  { %4596 = shalt.err (!%p4593_p11)
}
0x1d9e   :  { %3839 = dma.vmem_to_hbm [thread:$0]  %s3834_s12, 256, %s5286_s15, [#allocation12], %s4631_s30, %s4631_s30, %s4632_s16  }
0x1d9f   :  { %s4652_s29 = smov [#allocation10]  }
0x1da0   :  { %s3821_s18 = sshll.u32 %s4652_s29, 4  ;;  %s3822_s18 = int_to_ptr.vmem [resolvable:$true] %s3821_s18 }
0x1da1   :  { %s4597_s22 = scalar_lea.vmem %s3822_s18, 256  ;;  %p4602_p13 = scmp.lt.s32.totalorder %s3822_s18, %s3822_s18 }
0x1da2   :  { %p4598_p12 = scmp.ne.s32.totalorder %s3822_s18, %s4597_s22  ;;  %p4603_p0 = scmp.lt.s32.totalorder %s4597_s22, %s4597_s22 }
0x1da4   :  { %p4604_p1 = por %p4603_p0, %p4602_p13 }
0x1da6   :  { %p4605_p2 = pnand %p4604_p1, %p4598_p12 }
0x1e1f   :  { %v3807_v35 = vpop.xlane.xlu0 %3806 }
0x1e20   :  { %4483 = vrcp.f32 %v3807_v35 }
0x1e23   :  { %v3809_v37 = vpop.xlane.xlu0 %3808 }
0x1e24   :  { %4485 = vrcp.f32 %v3809_v37 }
0x1e2a   :  { %v4484_v38 = vpop.eup %4483 }
0x1e2b   :  { %v3811_v15 = vmul.f32 %v4484_v38, %v4480_v33 }
0x1e2d   :  { %3814 = vst [vmem:[#allocation10] sm:$0xff] %v3811_v15 }
0x1e2e   :  { %v4486_v16 = vpop.eup %4485 }
0x1e2f   :  { %v3813_v39 = vmul.f32 %v4486_v16, %v4482_v27 }
0x1e31   :  { %3815 = vst [vmem:[#allocation10 + $0x8] sm:$0xff] %v3813_v39 }
0x1e32   :  { %4608 = shalt.err (!%p4605_p2)
}
0x1e33   :  { %s4609_s23 = scalar_lea.hbm %s5285_s14, 256 }
0x1e34   :  { %p4610_p3 = scmp.ne.s32.totalorder %s5285_s14, %s4609_s23  ;;  %p4613_p4 = scmp.lt.u32.totalorder %s4609_s23, %s5285_s14 }
0x1e36   :  { %p4615_p5 = pnand %p4613_p4, %p4610_p3 }
0x1e38   :  { %4618 = shalt.err (!%p4615_p5)
}
0x1e39   :  { %3827 = dma.vmem_to_hbm [thread:$0]  %s3822_s18, 256, %s5285_s14, [#allocation4], %s4631_s30, %s4631_s30, %s4632_s16  }
0x1e3a   :  { %4625 = dma.done.wait [#allocation4], 256  }
0x1e3b   :  { %4626 = vsyncadd [#allocation4], 4294967040 }
0x1e3c   :  { %4627 = dma.done.wait [#allocation12], 256  }
0x1e3d   :  { %4628 = vsyncadd [#allocation12], 4294967040 }
0x1e3e   :  { %3846 = vsyncpa [#allocation3], 1 }
0x1e3f   :  { %3847 = vsyncpa [#allocation6], 1 }
0x1e40   :  { %3848 = vsyncpa [#allocation9], 1 }
0x1e41   :  { %3849 = vsyncpa [#allocation4], 1 }
0x1e42   :  { %3850 = vsyncpa [#allocation12], 1 }

</bundles_post_ra>
